<compile_context>
chip_gen: v5e
topology: v5e:2x2
jax: 0.10.0
libtpu: 0.0.40
codegen_flags: <defaults>
</compile_context>

<pallas_src>
import math
from functools import partial

import jax
import jax.numpy as jnp
from jax.experimental import pallas as pl
from jax.experimental.pallas import tpu as pltpu


# ----------------------------- in-kernel helpers -----------------------------
def _layernorm(x, w, b, eps=1e-5):
    mu = jnp.mean(x, axis=-1, keepdims=True)
    var = jnp.mean((x - mu) ** 2, axis=-1, keepdims=True)
    return (x - mu) * jax.lax.rsqrt(var + eps) * w + b


def _gelu(x):
    # tanh-approx GELU: ~5 VALU ops + 1 EUP tanh.
    # TODO(synk): PyTorch activation='gelu' uses exact erf; tanh approx differs ~1e-3.
    c = math.sqrt(2.0 / math.pi)
    return 0.5 * x * (1.0 + jnp.tanh(c * (x + 0.044715 * x * x * x)))


# ------------------------------ fused forward kernel -------------------------
def _fused_forward_kernel(n_head, seq_len,
                          x_ref, pw_ref, pb_ref, cls_ref, mask_ref,
                          wqkv_ref, bqkv_ref, wo_ref, bo_ref,
                          w1_ref, b1_ref, w2_ref, b2_ref, ln_ref,
                          flnw_ref, flnb_ref, hw_ref, hb_ref,
                          o_ref, act_ref):
    layer = pl.program_id(0)
    n_layer = pl.num_programs(0)
    B = x_ref.shape[0]
    D = pw_ref.shape[1]
    S = seq_len
    N = B * S
    H = n_head
    Dh = D // H
    scale = 1.0 / math.sqrt(Dh)
    bf16 = jnp.bfloat16

    # ---- grid step 0: input projection + [cls | proj(x)] sequence assembly ----
    @pl.when(layer == 0)
    def _init():
        feats = jnp.dot(x_ref[...].astype(bf16), pw_ref[...],
                        preferred_element_type=jnp.float32) + pb_ref[...]       # (B, D)
        cls_b = jnp.broadcast_to(cls_ref[...], (B, D))                          # (B, D)
        seq = jnp.concatenate([cls_b[:, None, :], feats[:, None, :]], axis=1)   # (B, S, D)
        act_ref[...] = seq.reshape(N, D)                                        # one full store

    # ---- one TransformerEncoderLayer (post-norm, MHA + GELU FFN) --------------
    x2 = act_ref[...]                                                           # (N, D) f32

    qkv = jnp.dot(x2.astype(bf16), wqkv_ref[...],
                  preferred_element_type=jnp.float32) + bqkv_ref[...]           # (N, 3D)

    # batched multi-head attention: one einsum over all heads (no per-head loop,
    # no narrow column stores). Block-diagonal mask is layer-invariant (input).
    q3 = qkv[:, 0 * D:1 * D].reshape(N, H, Dh).astype(bf16)
    k3 = qkv[:, 1 * D:2 * D].reshape(N, H, Dh).astype(bf16)
    v3 = qkv[:, 2 * D:3 * D].reshape(N, H, Dh).astype(bf16)
    s = jnp.einsum('qhd,khd->hqk', q3, k3,
                   preferred_element_type=jnp.float32) * scale + mask_ref[...]  # (H, N, N)
    s = s - jnp.max(s, axis=-1, keepdims=True)
    p = jnp.exp(s)
    p = p * pl.reciprocal(jnp.sum(p, axis=-1, keepdims=True), approx=True)
    ctx = jnp.einsum('hqk,khd->qhd', p.astype(bf16), v3,
                     preferred_element_type=jnp.float32)                        # (N, H, Dh)

    attn = jnp.dot(ctx.reshape(N, D).astype(bf16), wo_ref[...],
                   preferred_element_type=jnp.float32) + bo_ref[...]
    y = _layernorm(x2 + attn, ln_ref[0:1, :], ln_ref[1:2, :])

    h1 = _gelu(jnp.dot(y.astype(bf16), w1_ref[...],
                       preferred_element_type=jnp.float32) + b1_ref[...])
    h2 = jnp.dot(h1.astype(bf16), w2_ref[...],
                 preferred_element_type=jnp.float32) + b2_ref[...]
    y = _layernorm(y + h2, ln_ref[2:3, :], ln_ref[3:4, :])

    act_ref[...] = y                        # carried to the next grid step

    # ---- last grid step: final LayerNorm on cls tokens + classifier head ------
    @pl.when(layer == n_layer - 1)
    def _head():
        cls_emb = y.reshape(B, S, D)[:, 0, :]                       # (B, D) gather
        z = _layernorm(cls_emb, flnw_ref[...], flnb_ref[...])
        o_ref[...] = jnp.dot(z.astype(bf16), hw_ref[...],
                             preferred_element_type=jnp.float32) + hb_ref[...]


# --------------------------------- specs / wrapper ---------------------------
def _invariant_spec(shape):
    """Layer-invariant input: same block every grid step; single-buffer if possible."""
    index_map = lambda l: (0,) * len(shape)
    if hasattr(pl, "Buffered"):
        try:
            return pl.BlockSpec(shape, index_map, pipeline_mode=pl.Buffered(1))
        except Exception:
            pass  # older JAX: fall back to default (double-buffered) spec
    return pl.BlockSpec(shape, index_map)


def _per_layer_spec(shape):
    """Stacked-by-layer input streamed one layer per grid step (2-deep pipeline)."""
    return pl.BlockSpec((None,) + shape, lambda l: (l,) + (0,) * len(shape))


def _derive_vmem_limit(B, S, in_dim, D, c_pad):
    """VMEM budget from the actual working set; capped for v7x's 64 MiB ceiling."""
    f32, bf16 = 4, 2
    N = B * S
    per_layer = 12 * D * D * bf16 + 9 * D * f32 + 4 * D * f32      # weights + biases + LN
    invariant = (B * in_dim + N * N + 4 * D + c_pad) * f32 \
                + (in_dim * D + D * c_pad) * bf16
    resident = N * D * f32                                          # activation scratch
    out = B * c_pad * f32
    need = 2 * per_layer + 2 * invariant + resident + 2 * out + (4 << 20)
    return int(max(8 << 20, min(need, 56 << 20)))


def fused_transformer_forward(x, params, n_head, n_classes):
    B, in_dim = x.shape
    D = params['proj_w'].shape[1]
    L = params['wqkv'].shape[0]
    S = 2                                      # 1 cls token + 1 projected token
    N = B * S
    c_pad = params['head_w'].shape[1]

    # layer-invariant block-diagonal mask: row (b, s) attends only within batch b
    row_b = jnp.arange(N, dtype=jnp.int32) // S
    mask = jnp.where(row_b[:, None] == row_b[None, :], 0.0, -1e30).astype(jnp.float32)

    out = pl.pallas_call(
        partial(_fused_forward_kernel, n_head, S),
        out_shape=jax.ShapeDtypeStruct((B, c_pad), jnp.float32),
        grid_spec=pltpu.PrefetchScalarGridSpec(
            num_scalar_prefetch=0,
            grid=(L,),
            in_specs=[
                _invariant_spec((B, in_dim)),        # x
                _invariant_spec((in_dim, D)),        # proj_w (in, out), bf16
                _invariant_spec((1, D)),             # proj_b
                _invariant_spec((1, D)),             # cls token
                _invariant_spec((N, N)),             # block-diagonal attention mask
                _per_layer_spec((D, 3 * D)),         # in_proj weight (in, out), bf16
                _per_layer_spec((1, 3 * D)),         # in_proj bias
                _per_layer_spec((D, D)),             # out_proj weight
                _per_layer_spec((1, D)),             # out_proj bias
                _per_layer_spec((D, 4 * D)),         # linear1 weight
                _per_layer_spec((1, 4 * D)),         # linear1 bias
                _per_layer_spec((4 * D, D)),         # linear2 weight
                _per_layer_spec((1, D)),             # linear2 bias
                _per_layer_spec((4, D)),             # [norm1.w, norm1.b, norm2.w, norm2.b]
                _invariant_spec((1, D)),             # final LayerNorm weight
                _invariant_spec((1, D)),             # final LayerNorm bias
                _invariant_spec((D, c_pad)),         # head weight (lane-padded to 128)
                _invariant_spec((1, c_pad)),         # head bias   (lane-padded to 128)
            ],
            out_specs=pl.BlockSpec((B, c_pad), lambda l: (0, 0)),
            scratch_shapes=[
                pltpu.VMEM((N, D), jnp.float32),     # resident activation
            ]),
        compiler_params=pltpu.CompilerParams(
            dimension_semantics=("arbitrary",),      # layers carry state -> sequential
            vmem_limit_bytes=_derive_vmem_limit(B, S, in_dim, D, c_pad)),
    )(x,
      params['proj_w'], params['proj_b'], params['cls'], mask,
      params['wqkv'], params['bqkv'], params['wo'], params['bo'],
      params['w1'], params['b1'], params['w2'], params['b2'], params['ln'],
      params['lnw'], params['lnb'], params['head_w'], params['head_b'])
    return out[:, :n_classes]


# --------------------------------- parameters --------------------------------
def init_params(key, in_dim, d_model, n_head, n_layer, n_classes):
    assert d_model % n_head == 0
    bf16 = jnp.bfloat16

    def lin(k, in_f, out_f):
        # nn.Linear-style init, stored pre-transposed as (in_features, out_features)
        kw, kb = jax.random.split(k)
        bound = 1.0 / math.sqrt(in_f)
        w = jax.random.uniform(kw, (in_f, out_f), jnp.float32, -bound, bound)
        b = jax.random.uniform(kb, (1, out_f), jnp.float32, -bound, bound)
        return w, b

    keys = jax.random.split(key, 2 + n_layer)
    p = {}
    pw, pb = lin(keys[0], in_dim, d_model)
    p['proj_w'] = pw.astype(bf16)
    p['proj_b'] = pb
    p['cls'] = jnp.zeros((1, d_model), jnp.float32)           # nn.Parameter(zeros)

    ones = jnp.ones((d_model,), jnp.float32)
    zeros = jnp.zeros((d_model,), jnp.float32)
    wqkv, bqkv, wo, bo, w1, b1, w2, b2, ln = ([] for _ in range(9))
    for li in range(n_layer):
        lk = jax.random.split(keys[2 + li], 4)
        a, c = lin(lk[0], d_model, 3 * d_model); wqkv.append(a); bqkv.append(c)
        a, c = lin(lk[1], d_model, d_model);     wo.append(a);   bo.append(c)
        a, c = lin(lk[2], d_model, 4 * d_model); w1.append(a);   b1.append(c)
        a, c = lin(lk[3], 4 * d_model, d_model); w2.append(a);   b2.append(c)
        ln.append(jnp.stack([ones, zeros, ones, zeros], axis=0))   # (4, D)
    p['wqkv'] = jnp.stack(wqkv).astype(bf16)     # (L, D, 3D)
    p['bqkv'] = jnp.stack(bqkv)                  # (L, 1, 3D)
    p['wo'] = jnp.stack(wo).astype(bf16)         # (L, D, D)
    p['bo'] = jnp.stack(bo)                      # (L, 1, D)
    p['w1'] = jnp.stack(w1).astype(bf16)         # (L, D, 4D)
    p['b1'] = jnp.stack(b1)                      # (L, 1, 4D)
    p['w2'] = jnp.stack(w2).astype(bf16)         # (L, 4D, D)
    p['b2'] = jnp.stack(b2)                      # (L, 1, D)
    p['ln'] = jnp.stack(ln)                      # (L, 4, D)

    p['lnw'] = jnp.ones((1, d_model), jnp.float32)
    p['lnb'] = jnp.zeros((1, d_model), jnp.float32)

    hw, hb = lin(keys[1], d_model, n_classes)
    c_pad = max(128, ((n_classes + 127) // 128) * 128)   # lane-dense head output
    p['head_w'] = (jnp.zeros((d_model, c_pad), jnp.float32)
                   .at[:, :n_classes].set(hw).astype(bf16))
    p['head_b'] = jnp.zeros((1, c_pad), jnp.float32).at[:, :n_classes].set(hb)
    return p


if __name__ == "__main__":
    # small shapes consistent with the module (in_dim -> d_model, seq = 1 cls + 1 token)
    B, IN_DIM, D_MODEL, N_HEAD, N_LAYER, N_CLASSES = 2, 64, 32, 4, 2, 4

    key = jax.random.PRNGKey(0)
    kx, kp = jax.random.split(key)
    x = jax.random.normal(kx, (B, IN_DIM), jnp.float32)
    params = init_params(kp, IN_DIM, D_MODEL, N_HEAD, N_LAYER, N_CLASSES)

    logits = fused_transformer_forward(x, params, N_HEAD, N_CLASSES)
    jax.block_until_ready(logits)
    assert logits.shape == (B, N_CLASSES) and logits.dtype == jnp.float32
    assert bool(jnp.all(jnp.isfinite(logits)))
    print("KERNEL_OK")
</pallas_src>

<mosaic_0001>
module attributes {stable_mosaic.version = 11 : i64} {
  func.func @_fused_forward_kernel(%arg0: i32, %arg1: memref<2x64xf32, #tpu.memory_space<vmem>>, %arg2: memref<64x32xbf16, #tpu.memory_space<vmem>>, %arg3: memref<1x32xf32, #tpu.memory_space<vmem>>, %arg4: memref<1x32xf32, #tpu.memory_space<vmem>>, %arg5: memref<4x4xf32, #tpu.memory_space<vmem>>, %arg6: memref<1x32x96xbf16, #tpu.memory_space<vmem>>, %arg7: memref<1x1x96xf32, #tpu.memory_space<vmem>>, %arg8: memref<1x32x32xbf16, #tpu.memory_space<vmem>>, %arg9: memref<1x1x32xf32, #tpu.memory_space<vmem>>, %arg10: memref<1x32x128xbf16, #tpu.memory_space<vmem>>, %arg11: memref<1x1x128xf32, #tpu.memory_space<vmem>>, %arg12: memref<1x128x32xbf16, #tpu.memory_space<vmem>>, %arg13: memref<1x1x32xf32, #tpu.memory_space<vmem>>, %arg14: memref<1x4x32xf32, #tpu.memory_space<vmem>>, %arg15: memref<1x32xf32, #tpu.memory_space<vmem>>, %arg16: memref<1x32xf32, #tpu.memory_space<vmem>>, %arg17: memref<32x128xbf16, #tpu.memory_space<vmem>>, %arg18: memref<1x128xf32, #tpu.memory_space<vmem>>, %arg19: memref<2x128xf32, #tpu.memory_space<vmem>>, %arg20: memref<4x32xf32, #tpu.memory_space<vmem>>) attributes {dimension_semantics = [#tpu.dimension_semantics<arbitrary>], iteration_bounds = array<i64: 2>, scalar_prefetch = 0 : i64, scratch_operands = 1 : i64, tpu.core_type = #tpu.core_type<tc>, window_params = [{pipeline_mode = #tpu.pipeline_mode<synchronous>, transform_indices = @transform_0, window_bounds = array<i64: 2, 64>}, {pipeline_mode = #tpu.pipeline_mode<synchronous>, transform_indices = @transform_1, window_bounds = array<i64: 64, 32>}, {pipeline_mode = #tpu.pipeline_mode<synchronous>, transform_indices = @transform_2, window_bounds = array<i64: 1, 32>}, {pipeline_mode = #tpu.pipeline_mode<synchronous>, transform_indices = @transform_3, window_bounds = array<i64: 1, 32>}, {pipeline_mode = #tpu.pipeline_mode<synchronous>, transform_indices = @transform_4, window_bounds = array<i64: 4, 4>}, {transform_indices = @transform_5, window_bounds = array<i64: 1, 32, 96>}, {transform_indices = @transform_6, window_bounds = array<i64: 1, 1, 96>}, {transform_indices = @transform_7, window_bounds = array<i64: 1, 32, 32>}, {transform_indices = @transform_8, window_bounds = array<i64: 1, 1, 32>}, {transform_indices = @transform_9, window_bounds = array<i64: 1, 32, 128>}, {transform_indices = @transform_10, window_bounds = array<i64: 1, 1, 128>}, {transform_indices = @transform_11, window_bounds = array<i64: 1, 128, 32>}, {transform_indices = @transform_12, window_bounds = array<i64: 1, 1, 32>}, {transform_indices = @transform_13, window_bounds = array<i64: 1, 4, 32>}, {pipeline_mode = #tpu.pipeline_mode<synchronous>, transform_indices = @transform_14, window_bounds = array<i64: 1, 32>}, {pipeline_mode = #tpu.pipeline_mode<synchronous>, transform_indices = @transform_15, window_bounds = array<i64: 1, 32>}, {pipeline_mode = #tpu.pipeline_mode<synchronous>, transform_indices = @transform_16, window_bounds = array<i64: 32, 128>}, {pipeline_mode = #tpu.pipeline_mode<synchronous>, transform_indices = @transform_17, window_bounds = array<i64: 1, 128>}, {pipeline_mode = #tpu.pipeline_mode<synchronous>, transform_indices = @transform_18, window_bounds = array<i64: 2, 128>}]} {
    %c0_i32 = arith.constant 0 : i32
    %0 = arith.cmpi eq, %arg0, %c0_i32 : i32
    %1 = arith.extui %0 : i1 to i32
    %c0_i32_0 = arith.constant 0 : i32
    %2 = arith.cmpi ne, %1, %c0_i32_0 : i32
    scf.if %2 {
      %c0_62 = arith.constant 0 : index
      %c0_63 = arith.constant 0 : index
      %137 = vector.load %arg1[%c0_62, %c0_63] : memref<2x64xf32, #tpu.memory_space<vmem>>, vector<2x64xf32>
      %138 = arith.truncf %137 : vector<2x64xf32> to vector<2x64xbf16>
      %c0_64 = arith.constant 0 : index
      %c0_65 = arith.constant 0 : index
      %139 = vector.load %arg2[%c0_64, %c0_65] : memref<64x32xbf16, #tpu.memory_space<vmem>>, vector<64x32xbf16>
      %cst_66 = arith.constant dense<0.000000e+00> : vector<2x32xf32>
      %140 = tpu.matmul %138, %139, %cst_66 {dimension_numbers = #tpu.dot_dimension_numbers<[1], [0], [0], [1], [0, 0, 1, 1], [], []>} : vector<2x64xbf16>, vector<64x32xbf16>, vector<2x32xf32> -> vector<2x32xf32>
      %c0_67 = arith.constant 0 : index
      %c0_68 = arith.constant 0 : index
      %141 = vector.load %arg3[%c0_67, %c0_68] : memref<1x32xf32, #tpu.memory_space<vmem>>, vector<1x32xf32>
      %142 = vector.broadcast %141 : vector<1x32xf32> to vector<2x32xf32>
      %143 = arith.addf %140, %142 : vector<2x32xf32>
      %c0_69 = arith.constant 0 : index
      %c0_70 = arith.constant 0 : index
      %144 = vector.load %arg4[%c0_69, %c0_70] : memref<1x32xf32, #tpu.memory_space<vmem>>, vector<1x32xf32>
      %145 = vector.shape_cast %144 : vector<1x32xf32> to vector<1x32xf32>
      %146 = vector.broadcast %145 : vector<1x32xf32> to vector<2x32xf32>
      %147 = vector.shape_cast %146 : vector<2x32xf32> to vector<2x1x32xf32>
      %148 = vector.shape_cast %143 : vector<2x32xf32> to vector<2x1x32xf32>
      %149 = tpu.concatenate %147, %148 in 1 : vector<2x1x32xf32>, vector<2x1x32xf32> -> vector<2x2x32xf32>
      %150 = vector.shape_cast %149 : vector<2x2x32xf32> to vector<4x32xf32>
      %c0_71 = arith.constant 0 : index
      %c0_72 = arith.constant 0 : index
      %151 = vector.load %arg20[%c0_71, %c0_72] : memref<4x32xf32, #tpu.memory_space<vmem>>, vector<4x32xf32>
      tpu.vector_store %arg20[%c0_71, %c0_72], %150 {strides = array<i32>} : memref<4x32xf32, #tpu.memory_space<vmem>>, vector<4x32xf32>,
    } else {
    }
    %c0 = arith.constant 0 : index
    %c0_1 = arith.constant 0 : index
    %3 = vector.load %arg20[%c0, %c0_1] : memref<4x32xf32, #tpu.memory_space<vmem>>, vector<4x32xf32>
    %4 = arith.truncf %3 : vector<4x32xf32> to vector<4x32xbf16>
    %c0_2 = arith.constant 0 : index
    %c0_3 = arith.constant 0 : index
    %c0_4 = arith.constant 0 : index
    %5 = vector.load %arg6[%c0_2, %c0_3, %c0_4] : memref<1x32x96xbf16, #tpu.memory_space<vmem>>, vector<1x32x96xbf16>
    %6 = vector.shape_cast %5 : vector<1x32x96xbf16> to vector<32x96xbf16>
    %cst = arith.constant dense<0.000000e+00> : vector<4x96xf32>
    %7 = tpu.matmul %4, %6, %cst {dimension_numbers = #tpu.dot_dimension_numbers<[1], [0], [0], [1], [0, 0, 1, 1], [], []>} : vector<4x32xbf16>, vector<32x96xbf16>, vector<4x96xf32> -> vector<4x96xf32>
    %c0_5 = arith.constant 0 : index
    %c0_6 = arith.constant 0 : index
    %c0_7 = arith.constant 0 : index
    %8 = vector.load %arg7[%c0_5, %c0_6, %c0_7] : memref<1x1x96xf32, #tpu.memory_space<vmem>>, vector<1x1x96xf32>
    %9 = vector.shape_cast %8 : vector<1x1x96xf32> to vector<1x96xf32>
    %10 = vector.broadcast %9 : vector<1x96xf32> to vector<4x96xf32>
    %11 = arith.addf %7, %10 : vector<4x96xf32>
    %12 = vector.extract_strided_slice %11 {offsets = [0, 0], sizes = [4, 32], strides = [1, 1]} : vector<4x96xf32> to vector<4x32xf32>
    %13 = vector.shape_cast %12 : vector<4x32xf32> to vector<4x4x8xf32>
    %14 = arith.truncf %13 : vector<4x4x8xf32> to vector<4x4x8xbf16>
    %15 = vector.extract_strided_slice %11 {offsets = [0, 32], sizes = [4, 32], strides = [1, 1]} : vector<4x96xf32> to vector<4x32xf32>
    %16 = vector.shape_cast %15 : vector<4x32xf32> to vector<4x4x8xf32>
    %17 = arith.truncf %16 : vector<4x4x8xf32> to vector<4x4x8xbf16>
    %18 = vector.extract_strided_slice %11 {offsets = [0, 64], sizes = [4, 32], strides = [1, 1]} : vector<4x96xf32> to vector<4x32xf32>
    %19 = vector.shape_cast %18 : vector<4x32xf32> to vector<4x4x8xf32>
    %20 = arith.truncf %19 : vector<4x4x8xf32> to vector<4x4x8xbf16>
    "tpu.trace_start"() <{level = 10 : i32, message = "qhd,khd->hqk"}> : () -> ()
    %cst_8 = arith.constant dense<0.000000e+00> : vector<4x4x4xf32>
    %21 = tpu.matmul %14, %17, %cst_8 {dimension_numbers = #tpu.dot_dimension_numbers<[2], [2], [0], [0], [0, 1, 0, 0, 1, 0], [1], [1]>} : vector<4x4x8xbf16>, vector<4x4x8xbf16>, vector<4x4x4xf32> -> vector<4x4x4xf32>
    "tpu.trace_stop"() : () -> ()
    %cst_9 = arith.constant 0.353553385 : f32
    %22 = vector.broadcast %cst_9 : f32 to vector<4x4x4xf32>
    %23 = arith.mulf %21, %22 : vector<4x4x4xf32>
    %c0_10 = arith.constant 0 : index
    %c0_11 = arith.constant 0 : index
    %24 = vector.load %arg5[%c0_10, %c0_11] : memref<4x4xf32, #tpu.memory_space<vmem>>, vector<4x4xf32>
    %25 = vector.shape_cast %24 : vector<4x4xf32> to vector<1x4x4xf32>
    %26 = vector.broadcast %25 : vector<1x4x4xf32> to vector<4x4x4xf32>
    %27 = arith.addf %23, %26 : vector<4x4x4xf32>
    %cst_12 = arith.constant dense<0xFF800000> : vector<4x4xf32>
    %28 = vector.multi_reduction <maximumf>, %27, %cst_12 [2] : vector<4x4x4xf32> to vector<4x4xf32>
    %29 = vector.shape_cast %28 : vector<4x4xf32> to vector<4x4x1xf32>
    %30 = vector.broadcast %29 : vector<4x4x1xf32> to vector<4x4x4xf32>
    %31 = arith.subf %27, %30 : vector<4x4x4xf32>
    %32 = math.exp %31 : vector<4x4x4xf32>
    %cst_13 = arith.constant dense<0.000000e+00> : vector<4x4xf32>
    %33 = vector.multi_reduction <add>, %32, %cst_13 [2] : vector<4x4x4xf32> to vector<4x4xf32>
    %34 = vector.shape_cast %33 : vector<4x4xf32> to vector<4x4x1xf32>
    %35 = tpu.reciprocal %34 {approx = true} : vector<4x4x1xf32> -> vector<4x4x1xf32>
    %36 = vector.broadcast %35 : vector<4x4x1xf32> to vector<4x4x4xf32>
    %37 = arith.mulf %32, %36 : vector<4x4x4xf32>
    %38 = arith.truncf %37 : vector<4x4x4xf32> to vector<4x4x4xbf16>
    "tpu.trace_start"() <{level = 10 : i32, message = "hqk,khd->qhd"}> : () -> ()
    %cst_14 = arith.constant dense<0.000000e+00> : vector<4x8x4xf32>
    %39 = tpu.matmul %20, %38, %cst_14 {dimension_numbers = #tpu.dot_dimension_numbers<[0], [2], [2], [1], [0, 1, 0, 2, 1, 1], [1], [0]>} : vector<4x4x8xbf16>, vector<4x4x4xbf16>, vector<4x8x4xf32> -> vector<4x8x4xf32>
    %40 = tpu.transpose %39, [2, 0, 1] : vector<4x8x4xf32> -> vector<4x4x8xf32>
    "tpu.trace_stop"() : () -> ()
    %41 = vector.shape_cast %40 : vector<4x4x8xf32> to vector<4x32xf32>
    %42 = arith.truncf %41 : vector<4x32xf32> to vector<4x32xbf16>
    %c0_15 = arith.constant 0 : index
    %c0_16 = arith.constant 0 : index
    %c0_17 = arith.constant 0 : index
    %43 = vector.load %arg8[%c0_15, %c0_16, %c0_17] : memref<1x32x32xbf16, #tpu.memory_space<vmem>>, vector<1x32x32xbf16>
    %44 = vector.shape_cast %43 : vector<1x32x32xbf16> to vector<32x32xbf16>
    %cst_18 = arith.constant dense<0.000000e+00> : vector<4x32xf32>
    %45 = tpu.matmul %42, %44, %cst_18 {dimension_numbers = #tpu.dot_dimension_numbers<[1], [0], [0], [1], [0, 0, 1, 1], [], []>} : vector<4x32xbf16>, vector<32x32xbf16>, vector<4x32xf32> -> vector<4x32xf32>
    %c0_19 = arith.constant 0 : index
    %c0_20 = arith.constant 0 : index
    %c0_21 = arith.constant 0 : index
    %46 = vector.load %arg9[%c0_19, %c0_20, %c0_21] : memref<1x1x32xf32, #tpu.memory_space<vmem>>, vector<1x1x32xf32>
    %47 = vector.shape_cast %46 : vector<1x1x32xf32> to vector<1x32xf32>
    %48 = vector.broadcast %47 : vector<1x32xf32> to vector<4x32xf32>
    %49 = arith.addf %45, %48 : vector<4x32xf32>
    %50 = arith.addf %3, %49 : vector<4x32xf32>
    %c0_22 = arith.constant 0 : index
    %c0_23 = arith.constant 0 : index
    %c0_24 = arith.constant 0 : index
    %51 = vector.load %arg14[%c0_22, %c0_23, %c0_24] : memref<1x4x32xf32, #tpu.memory_space<vmem>>, vector<1x1x32xf32>
    %52 = vector.shape_cast %51 : vector<1x1x32xf32> to vector<1x32xf32>
    %c0_25 = arith.constant 0 : index
    %c1 = arith.constant 1 : index
    %c0_26 = arith.constant 0 : index
    %53 = vector.load %arg14[%c0_25, %c1, %c0_26] : memref<1x4x32xf32, #tpu.memory_space<vmem>>, vector<1x1x32xf32>
    %54 = vector.shape_cast %53 : vector<1x1x32xf32> to vector<1x32xf32>
    %cst_27 = arith.constant dense<0.000000e+00> : vector<4xf32>
    %55 = vector.multi_reduction <add>, %50, %cst_27 [1] : vector<4x32xf32> to vector<4xf32>
    %56 = vector.shape_cast %55 : vector<4xf32> to vector<4x1xf32>
    %cst_28 = arith.constant 3.200000e+01 : f32
    %57 = vector.broadcast %cst_28 : f32 to vector<4x1xf32>
    %58 = arith.divf %56, %57 : vector<4x1xf32>
    %59 = vector.broadcast %58 : vector<4x1xf32> to vector<4x32xf32>
    %60 = arith.subf %50, %59 : vector<4x32xf32>
    %61 = arith.mulf %60, %60 : vector<4x32xf32>
    %cst_29 = arith.constant dense<0.000000e+00> : vector<4xf32>
    %62 = vector.multi_reduction <add>, %61, %cst_29 [1] : vector<4x32xf32> to vector<4xf32>
    %63 = vector.shape_cast %62 : vector<4xf32> to vector<4x1xf32>
    %cst_30 = arith.constant 3.200000e+01 : f32
    %64 = vector.broadcast %cst_30 : f32 to vector<4x1xf32>
    %65 = arith.divf %63, %64 : vector<4x1xf32>
    %66 = vector.broadcast %58 : vector<4x1xf32> to vector<4x32xf32>
    %67 = arith.subf %50, %66 : vector<4x32xf32>
    %cst_31 = arith.constant 9.99999974E-6 : f32
    %68 = vector.broadcast %cst_31 : f32 to vector<4x1xf32>
    %69 = arith.addf %65, %68 : vector<4x1xf32>
    %70 = math.rsqrt %69 : vector<4x1xf32>
    %71 = vector.broadcast %70 : vector<4x1xf32> to vector<4x32xf32>
    %72 = arith.mulf %67, %71 : vector<4x32xf32>
    %73 = vector.broadcast %52 : vector<1x32xf32> to vector<4x32xf32>
    %74 = arith.mulf %72, %73 : vector<4x32xf32>
    %75 = vector.broadcast %54 : vector<1x32xf32> to vector<4x32xf32>
    %76 = arith.addf %74, %75 : vector<4x32xf32>
    %77 = arith.truncf %76 : vector<4x32xf32> to vector<4x32xbf16>
    %c0_32 = arith.constant 0 : index
    %c0_33 = arith.constant 0 : index
    %c0_34 = arith.constant 0 : index
    %78 = vector.load %arg10[%c0_32, %c0_33, %c0_34] : memref<1x32x128xbf16, #tpu.memory_space<vmem>>, vector<1x32x128xbf16>
    %79 = vector.shape_cast %78 : vector<1x32x128xbf16> to vector<32x128xbf16>
    %cst_35 = arith.constant dense<0.000000e+00> : vector<4x128xf32>
    %80 = tpu.matmul %77, %79, %cst_35 {dimension_numbers = #tpu.dot_dimension_numbers<[1], [0], [0], [1], [0, 0, 1, 1], [], []>} : vector<4x32xbf16>, vector<32x128xbf16>, vector<4x128xf32> -> vector<4x128xf32>
    %c0_36 = arith.constant 0 : index
    %c0_37 = arith.constant 0 : index
    %c0_38 = arith.constant 0 : index
    %81 = vector.load %arg11[%c0_36, %c0_37, %c0_38] : memref<1x1x128xf32, #tpu.memory_space<vmem>>, vector<1x1x128xf32>
    %82 = vector.shape_cast %81 : vector<1x1x128xf32> to vector<1x128xf32>
    %83 = vector.broadcast %82 : vector<1x128xf32> to vector<4x128xf32>
    %84 = arith.addf %80, %83 : vector<4x128xf32>
    %cst_39 = arith.constant 5.000000e-01 : f32
    %85 = vector.broadcast %cst_39 : f32 to vector<4x128xf32>
    %86 = arith.mulf %85, %84 : vector<4x128xf32>
    %cst_40 = arith.constant 4.471500e-02 : f32
    %87 = vector.broadcast %cst_40 : f32 to vector<4x128xf32>
    %88 = arith.mulf %87, %84 : vector<4x128xf32>
    %89 = arith.mulf %88, %84 : vector<4x128xf32>
    %90 = arith.mulf %89, %84 : vector<4x128xf32>
    %91 = arith.addf %84, %90 : vector<4x128xf32>
    %cst_41 = arith.constant 0.797884583 : f32
    %92 = vector.broadcast %cst_41 : f32 to vector<4x128xf32>
    %93 = arith.mulf %92, %91 : vector<4x128xf32>
    %94 = math.tanh %93 : vector<4x128xf32>
    %cst_42 = arith.constant 1.000000e+00 : f32
    %95 = vector.broadcast %cst_42 : f32 to vector<4x128xf32>
    %96 = arith.addf %95, %94 : vector<4x128xf32>
    %97 = arith.mulf %86, %96 : vector<4x128xf32>
    %98 = arith.truncf %97 : vector<4x128xf32> to vector<4x128xbf16>
    %c0_43 = arith.constant 0 : index
    %c0_44 = arith.constant 0 : index
    %c0_45 = arith.constant 0 : index
    %99 = vector.load %arg12[%c0_43, %c0_44, %c0_45] : memref<1x128x32xbf16, #tpu.memory_space<vmem>>, vector<1x128x32xbf16>
    %100 = vector.shape_cast %99 : vector<1x128x32xbf16> to vector<128x32xbf16>
    %cst_46 = arith.constant dense<0.000000e+00> : vector<4x32xf32>
    %101 = tpu.matmul %98, %100, %cst_46 {dimension_numbers = #tpu.dot_dimension_numbers<[1], [0], [0], [1], [0, 0, 1, 1], [], []>} : vector<4x128xbf16>, vector<128x32xbf16>, vector<4x32xf32> -> vector<4x32xf32>
    %c0_47 = arith.constant 0 : index
    %c0_48 = arith.constant 0 : index
    %c0_49 = arith.constant 0 : index
    %102 = vector.load %arg13[%c0_47, %c0_48, %c0_49] : memref<1x1x32xf32, #tpu.memory_space<vmem>>, vector<1x1x32xf32>
    %103 = vector.shape_cast %102 : vector<1x1x32xf32> to vector<1x32xf32>
    %104 = vector.broadcast %103 : vector<1x32xf32> to vector<4x32xf32>
    %105 = arith.addf %101, %104 : vector<4x32xf32>
    %106 = arith.addf %76, %105 : vector<4x32xf32>
    %c0_50 = arith.constant 0 : index
    %c2 = arith.constant 2 : index
    %c0_51 = arith.constant 0 : index
    %107 = vector.load %arg14[%c0_50, %c2, %c0_51] : memref<1x4x32xf32, #tpu.memory_space<vmem>>, vector<1x1x32xf32>
    %108 = vector.shape_cast %107 : vector<1x1x32xf32> to vector<1x32xf32>
    %c0_52 = arith.constant 0 : index
    %c3 = arith.constant 3 : index
    %c0_53 = arith.constant 0 : index
    %109 = vector.load %arg14[%c0_52, %c3, %c0_53] : memref<1x4x32xf32, #tpu.memory_space<vmem>>, vector<1x1x32xf32>
    %110 = vector.shape_cast %109 : vector<1x1x32xf32> to vector<1x32xf32>
    %cst_54 = arith.constant dense<0.000000e+00> : vector<4xf32>
    %111 = vector.multi_reduction <add>, %106, %cst_54 [1] : vector<4x32xf32> to vector<4xf32>
    %112 = vector.shape_cast %111 : vector<4xf32> to vector<4x1xf32>
    %cst_55 = arith.constant 3.200000e+01 : f32
    %113 = vector.broadcast %cst_55 : f32 to vector<4x1xf32>
    %114 = arith.divf %112, %113 : vector<4x1xf32>
    %115 = vector.broadcast %114 : vector<4x1xf32> to vector<4x32xf32>
    %116 = arith.subf %106, %115 : vector<4x32xf32>
    %117 = arith.mulf %116, %116 : vector<4x32xf32>
    %cst_56 = arith.constant dense<0.000000e+00> : vector<4xf32>
    %118 = vector.multi_reduction <add>, %117, %cst_56 [1] : vector<4x32xf32> to vector<4xf32>
    %119 = vector.shape_cast %118 : vector<4xf32> to vector<4x1xf32>
    %cst_57 = arith.constant 3.200000e+01 : f32
    %120 = vector.broadcast %cst_57 : f32 to vector<4x1xf32>
    %121 = arith.divf %119, %120 : vector<4x1xf32>
    %122 = vector.broadcast %114 : vector<4x1xf32> to vector<4x32xf32>
    %123 = arith.subf %106, %122 : vector<4x32xf32>
    %cst_58 = arith.constant 9.99999974E-6 : f32
    %124 = vector.broadcast %cst_58 : f32 to vector<4x1xf32>
    %125 = arith.addf %121, %124 : vector<4x1xf32>
    %126 = math.rsqrt %125 : vector<4x1xf32>
    %127 = vector.broadcast %126 : vector<4x1xf32> to vector<4x32xf32>
    %128 = arith.mulf %123, %127 : vector<4x32xf32>
    %129 = vector.broadcast %108 : vector<1x32xf32> to vector<4x32xf32>
    %130 = arith.mulf %128, %129 : vector<4x32xf32>
    %131 = vector.broadcast %110 : vector<1x32xf32> to vector<4x32xf32>
    %132 = arith.addf %130, %131 : vector<4x32xf32>
    %c0_59 = arith.constant 0 : index
    %c0_60 = arith.constant 0 : index
    %133 = vector.load %arg20[%c0_59, %c0_60] : memref<4x32xf32, #tpu.memory_space<vmem>>, vector<4x32xf32>
    tpu.vector_store %arg20[%c0_59, %c0_60], %132 {strides = array<i32>} : memref<4x32xf32, #tpu.memory_space<vmem>>, vector<4x32xf32>,
    %c1_i32 = arith.constant 1 : i32
    %134 = arith.cmpi eq, %arg0, %c1_i32 : i32
    %135 = arith.extui %134 : i1 to i32
    %c0_i32_61 = arith.constant 0 : i32
    %136 = arith.cmpi ne, %135, %c0_i32_61 : i32
    scf.if %136 {
      %137 = vector.shape_cast %132 : vector<4x32xf32> to vector<2x2x32xf32>
      %138 = vector.extract_strided_slice %137 {offsets = [0, 0, 0], sizes = [2, 1, 32], strides = [1, 1, 1]} : vector<2x2x32xf32> to vector<2x1x32xf32>
      %139 = vector.shape_cast %138 : vector<2x1x32xf32> to vector<2x32xf32>
      %c0_62 = arith.constant 0 : index
      %c0_63 = arith.constant 0 : index
      %140 = vector.load %arg15[%c0_62, %c0_63] : memref<1x32xf32, #tpu.memory_space<vmem>>, vector<1x32xf32>
      %c0_64 = arith.constant 0 : index
      %c0_65 = arith.constant 0 : index
      %141 = vector.load %arg16[%c0_64, %c0_65] : memref<1x32xf32, #tpu.memory_space<vmem>>, vector<1x32xf32>
      %cst_66 = arith.constant dense<0.000000e+00> : vector<2xf32>
      %142 = vector.multi_reduction <add>, %139, %cst_66 [1] : vector<2x32xf32> to vector<2xf32>
      %143 = vector.shape_cast %142 : vector<2xf32> to vector<2x1xf32>
      %cst_67 = arith.constant 3.200000e+01 : f32
      %144 = vector.broadcast %cst_67 : f32 to vector<2x1xf32>
      %145 = arith.divf %143, %144 : vector<2x1xf32>
      %146 = vector.broadcast %145 : vector<2x1xf32> to vector<2x32xf32>
      %147 = arith.subf %139, %146 : vector<2x32xf32>
      %148 = arith.mulf %147, %147 : vector<2x32xf32>
      %cst_68 = arith.constant dense<0.000000e+00> : vector<2xf32>
      %149 = vector.multi_reduction <add>, %148, %cst_68 [1] : vector<2x32xf32> to vector<2xf32>
      %150 = vector.shape_cast %149 : vector<2xf32> to vector<2x1xf32>
      %cst_69 = arith.constant 3.200000e+01 : f32
      %151 = vector.broadcast %cst_69 : f32 to vector<2x1xf32>
      %152 = arith.divf %150, %151 : vector<2x1xf32>
      %153 = vector.broadcast %145 : vector<2x1xf32> to vector<2x32xf32>
      %154 = arith.subf %139, %153 : vector<2x32xf32>
      %cst_70 = arith.constant 9.99999974E-6 : f32
      %155 = vector.broadcast %cst_70 : f32 to vector<2x1xf32>
      %156 = arith.addf %152, %155 : vector<2x1xf32>
      %157 = math.rsqrt %156 : vector<2x1xf32>
      %158 = vector.broadcast %157 : vector<2x1xf32> to vector<2x32xf32>
      %159 = arith.mulf %154, %158 : vector<2x32xf32>
      %160 = vector.broadcast %140 : vector<1x32xf32> to vector<2x32xf32>
      %161 = arith.mulf %159, %160 : vector<2x32xf32>
      %162 = vector.broadcast %141 : vector<1x32xf32> to vector<2x32xf32>
      %163 = arith.addf %161, %162 : vector<2x32xf32>
      %164 = arith.truncf %163 : vector<2x32xf32> to vector<2x32xbf16>
      %c0_71 = arith.constant 0 : index
      %c0_72 = arith.constant 0 : index
      %165 = vector.load %arg17[%c0_71, %c0_72] : memref<32x128xbf16, #tpu.memory_space<vmem>>, vector<32x128xbf16>
      %cst_73 = arith.constant dense<0.000000e+00> : vector<2x128xf32>
      %166 = tpu.matmul %164, %165, %cst_73 {dimension_numbers = #tpu.dot_dimension_numbers<[1], [0], [0], [1], [0, 0, 1, 1], [], []>} : vector<2x32xbf16>, vector<32x128xbf16>, vector<2x128xf32> -> vector<2x128xf32>
      %c0_74 = arith.constant 0 : index
      %c0_75 = arith.constant 0 : index
      %167 = vector.load %arg18[%c0_74, %c0_75] : memref<1x128xf32, #tpu.memory_space<vmem>>, vector<1x128xf32>
      %168 = vector.broadcast %167 : vector<1x128xf32> to vector<2x128xf32>
      %169 = arith.addf %166, %168 : vector<2x128xf32>
      %c0_76 = arith.constant 0 : index
      %c0_77 = arith.constant 0 : index
      %170 = vector.load %arg19[%c0_76, %c0_77] : memref<2x128xf32, #tpu.memory_space<vmem>>, vector<2x128xf32>
      tpu.vector_store %arg19[%c0_76, %c0_77], %169 {strides = array<i32>} : memref<2x128xf32, #tpu.memory_space<vmem>>, vector<2x128xf32>,
    } else {
    }
    return
  }
  func.func @transform_0(%arg0: i32) -> (i32, i32) {
    %c0_i32 = arith.constant 0 : i32
    %c0_i32_0 = arith.constant 0 : i32
    %c0_i32_1 = arith.constant 0 : i32
    return %c0_i32, %c0_i32_0 : i32, i32
  }
  func.func @transform_1(%arg0: i32) -> (i32, i32) {
    %c0_i32 = arith.constant 0 : i32
    %c0_i32_0 = arith.constant 0 : i32
    %c0_i32_1 = arith.constant 0 : i32
    return %c0_i32, %c0_i32_0 : i32, i32
  }
  func.func @transform_2(%arg0: i32) -> (i32, i32) {
    %c0_i32 = arith.constant 0 : i32
    %c0_i32_0 = arith.constant 0 : i32
    %c0_i32_1 = arith.constant 0 : i32
    return %c0_i32, %c0_i32_0 : i32, i32
  }
  func.func @transform_3(%arg0: i32) -> (i32, i32) {
    %c0_i32 = arith.constant 0 : i32
    %c0_i32_0 = arith.constant 0 : i32
    %c0_i32_1 = arith.constant 0 : i32
    return %c0_i32, %c0_i32_0 : i32, i32
  }
  func.func @transform_4(%arg0: i32) -> (i32, i32) {
    %c0_i32 = arith.constant 0 : i32
    %c0_i32_0 = arith.constant 0 : i32
    %c0_i32_1 = arith.constant 0 : i32
    return %c0_i32, %c0_i32_0 : i32, i32
  }
  func.func @transform_5(%arg0: i32) -> (i32, i32, i32) {
    %c0_i32 = arith.constant 0 : i32
    %c0_i32_0 = arith.constant 0 : i32
    %c0_i32_1 = arith.constant 0 : i32
    return %arg0, %c0_i32, %c0_i32_0 : i32, i32, i32
  }
  func.func @transform_6(%arg0: i32) -> (i32, i32, i32) {
    %c0_i32 = arith.constant 0 : i32
    %c0_i32_0 = arith.constant 0 : i32
    %c0_i32_1 = arith.constant 0 : i32
    return %arg0, %c0_i32, %c0_i32_0 : i32, i32, i32
  }
  func.func @transform_7(%arg0: i32) -> (i32, i32, i32) {
    %c0_i32 = arith.constant 0 : i32
    %c0_i32_0 = arith.constant 0 : i32
    %c0_i32_1 = arith.constant 0 : i32
    return %arg0, %c0_i32, %c0_i32_0 : i32, i32, i32
  }
  func.func @transform_8(%arg0: i32) -> (i32, i32, i32) {
    %c0_i32 = arith.constant 0 : i32
    %c0_i32_0 = arith.constant 0 : i32
    %c0_i32_1 = arith.constant 0 : i32
    return %arg0, %c0_i32, %c0_i32_0 : i32, i32, i32
  }
  func.func @transform_9(%arg0: i32) -> (i32, i32, i32) {
    %c0_i32 = arith.constant 0 : i32
    %c0_i32_0 = arith.constant 0 : i32
    %c0_i32_1 = arith.constant 0 : i32
    return %arg0, %c0_i32, %c0_i32_0 : i32, i32, i32
  }
  func.func @transform_10(%arg0: i32) -> (i32, i32, i32) {
    %c0_i32 = arith.constant 0 : i32
    %c0_i32_0 = arith.constant 0 : i32
    %c0_i32_1 = arith.constant 0 : i32
    return %arg0, %c0_i32, %c0_i32_0 : i32, i32, i32
  }
  func.func @transform_11(%arg0: i32) -> (i32, i32, i32) {
    %c0_i32 = arith.constant 0 : i32
    %c0_i32_0 = arith.constant 0 : i32
    %c0_i32_1 = arith.constant 0 : i32
    return %arg0, %c0_i32, %c0_i32_0 : i32, i32, i32
  }
  func.func @transform_12(%arg0: i32) -> (i32, i32, i32) {
    %c0_i32 = arith.constant 0 : i32
    %c0_i32_0 = arith.constant 0 : i32
    %c0_i32_1 = arith.constant 0 : i32
    return %arg0, %c0_i32, %c0_i32_0 : i32, i32, i32
  }
  func.func @transform_13(%arg0: i32) -> (i32, i32, i32) {
    %c0_i32 = arith.constant 0 : i32
    %c0_i32_0 = arith.constant 0 : i32
    %c0_i32_1 = arith.constant 0 : i32
    return %arg0, %c0_i32, %c0_i32_0 : i32, i32, i32
  }
  func.func @transform_14(%arg0: i32) -> (i32, i32) {
    %c0_i32 = arith.constant 0 : i32
    %c0_i32_0 = arith.constant 0 : i32
    %c0_i32_1 = arith.constant 0 : i32
    return %c0_i32, %c0_i32_0 : i32, i32
  }
  func.func @transform_15(%arg0: i32) -> (i32, i32) {
    %c0_i32 = arith.constant 0 : i32
    %c0_i32_0 = arith.constant 0 : i32
    %c0_i32_1 = arith.constant 0 : i32
    return %c0_i32, %c0_i32_0 : i32, i32
  }
  func.func @transform_16(%arg0: i32) -> (i32, i32) {
    %c0_i32 = arith.constant 0 : i32
    %c0_i32_0 = arith.constant 0 : i32
    %c0_i32_1 = arith.constant 0 : i32
    return %c0_i32, %c0_i32_0 : i32, i32
  }
  func.func @transform_17(%arg0: i32) -> (i32, i32) {
    %c0_i32 = arith.constant 0 : i32
    %c0_i32_0 = arith.constant 0 : i32
    %c0_i32_1 = arith.constant 0 : i32
    return %c0_i32, %c0_i32_0 : i32, i32
  }
  func.func @transform_18(%arg0: i32) -> (i32, i32) {
    %c0_i32 = arith.constant 0 : i32
    %c0_i32_0 = arith.constant 0 : i32
    %c0_i32_1 = arith.constant 0 : i32
    return %c0_i32, %c0_i32_0 : i32, i32
  }
}

</mosaic_0001>

<bundles_post_ra>
// kernel: tpu_custom_call.1
= control target key start
LH: loop header
LB: loop body
LE: loop exit
PB: predicated region body
PF: predicated region fallthrough
CT: control target
= control target key end

     0   :  { %s3302_s0 = inlined_call_operand.vmem [shape: f32[2,64], index: 0, kind: input, shape index: {}]   ;;  %s3303_s1 = inlined_call_operand.vmem [shape: bf16[64,32], index: 1, kind: input, shape index: {}]   ;;  %s3304_s2 = inlined_call_operand.vmem [shape: f32[1,32], index: 2, kind: input, shape index: {}]   ;;  %s3305_s3 = inlined_call_operand.vmem [shape: f32[1,32], index: 3, kind: input, shape index: {}]   ;;  %s3306_s4 = inlined_call_operand.vmem [shape: f32[4,4], index: 4, kind: input, shape index: {}]   ;;  %s3307_s5 = inlined_call_operand.vmem [shape: bf16[2,32,96], index: 5, kind: input, shape index: {}]   ;;  %s3308_s6 = inlined_call_operand.vmem [shape: f32[2,1,96], index: 6, kind: input, shape index: {}]   ;;  %s3309_s7 = inlined_call_operand.vmem [shape: bf16[2,32,32], index: 7, kind: input, shape index: {}]   ;;  %s3310_s8 = inlined_call_operand.vmem [shape: f32[2,1,32], index: 8, kind: input, shape index: {}]   ;;  %s3311_s9 = inlined_call_operand.vmem [shape: bf16[2,32,128], index: 9, kind: input, shape index: {}]   ;;  %s3312_s10 = inlined_call_operand.vmem [shape: f32[2,1,128], index: 10, kind: input, shape index: {}]   ;;  %s3313_s11 = inlined_call_operand.vmem [shape: bf16[2,128,32], index: 11, kind: input, shape index: {}]   ;;  %s3314_s12 = inlined_call_operand.vmem [shape: f32[2,1,32], index: 12, kind: input, shape index: {}]   ;;  %s3315_s13 = inlined_call_operand.vmem [shape: f32[2,4,32], index: 13, kind: input, shape index: {}]   ;;  %s3316_s14 = inlined_call_operand.vmem [shape: f32[1,32], index: 14, kind: input, shape index: {}]   ;;  %s3317_s15 = inlined_call_operand.vmem [shape: f32[1,32], index: 15, kind: input, shape index: {}]   ;;  %s3318_s16 = inlined_call_operand.vmem [shape: bf16[32,128], index: 16, kind: input, shape index: {}]   ;;  %s3319_s17 = inlined_call_operand.vmem [shape: f32[1,128], index: 17, kind: input, shape index: {}]   ;;  %s3320_s18 = inlined_call_operand.hbm [shape: f32[2,128], index: 18, kind: output, shape index: {}]  }
   0x1   :  { %3323 = sst [smem:[#allocation7_spill]] %s3302_s0 }
   0x2   :  { %3324 = sst [smem:[#allocation8_spill]] %s3303_s1 }
   0x3   :  { %3325 = sst [smem:[#allocation9_spill]] %s3304_s2 }
   0x4   :  { %3326 = sst [smem:[#allocation10_spill]] %s3307_s5 }
   0x5   :  { %3327 = sst [smem:[#allocation11_spill]] %s3309_s7 }
   0x6   :  { %3328 = sst [smem:[#allocation12_spill]] %s3316_s14 }
   0x7   :  { %3329 = sst [smem:[#allocation13_spill]] %s3317_s15 }
   0x8   :  { %3330 = sst [smem:[#allocation14_spill]] %s3319_s17 }
   0x9   :  { %3331 = sst [smem:[#allocation15_spill]] %s3320_s18 }
   0xa   :  { %23 = vsyncpa [#allocation4], 0  ;;  %s2947_s27 = smov 0  }
   0xb LB: > { %3332 = sst [smem:[#allocation6_spill]] %s2837_s27  ;;  %s2953_s28 = sadd.s32 4294967295, %s2837_s27   ;;  %s2837_s27 = sphi %s2947_s27, %s29_s27  }
   0xc   : > { %p2528_p0 = scmp.ge.s32.totalorder %s2837_s27, 1  ;;  %p579_p1 = scmp.lt.s32.totalorder %s2837_s27, 3 }
   0xe   : > { %p580_p2 = pnand %p2528_p0, %p579_p1 }
   0xf   : > { %p659_p3 = scmp.lt.s32.totalorder (!%p580_p2), %s2953_s28, 1  ;;  %s3333_s5 = sld [smem:[#allocation10_spill]] (!%p580_p2) }
  0x10   : > { %583 = sbr.rel (%p580_p2) target bundleno = 3423 (0xd5f), region = 92  ;;  %s3334_s7 = sld [smem:[#allocation11_spill]] (!%p580_p2) }
  0x11   : > { %p2538_p4 = scmp.ne.s32.totalorder (!%p580_p2), %s2953_s28, 0 }
  0x15   : > { %s2959_s29 = scalar_select %p659_p3, %s2953_s28, 1 }
  0x16   : > { %s3335_s0 = sld [smem:[#allocation8_spill]] (!%p2538_p4) }
  0x17   : > { %s2637_s30 = sshll.u32 %s2959_s29, 4  ;;  %s682_s20 = scalar_lea.vmem %s3312_s10, %s2959_s29 }
  0x18   : > { %s2969_s22 = scalar_lea.vmem %s3333_s5, %s2637_s30  ;;  %s2974_s24 = scalar_lea.vmem %s3334_s7, %s2637_s30 }
  0x19   : > { %s2983_s15 = scalar_lea.vmem %s3311_s9, %s2637_s30  ;;  %s2640_s21 = sshll.u32 %s2959_s29, 6 }
  0x1a   : > { %s2993_s2 = scalar_lea.vmem %s3313_s11, %s2640_s21  ;;  %s690_s25 = scalar_lea.vmem %s3314_s12, %s2959_s29 }
  0x1b   : > { %s2537_s26 = sshll.u32 %s2959_s29, 2  ;;  %699 = sbr.rel (%p2538_p4) target bundleno = 190 (0xbe), region = 96 }
  0x1c   : > { %s3003_s17 = scalar_lea.vmem %s3315_s13, %s2537_s26  ;;  %s3336_s26 = sld [smem:[#allocation7_spill]] (!%p2538_p4) }
  0x1d   : > { %s3337_s5 = sld [smem:[#allocation9_spill]] (!%p2538_p4) }
  0x20   : > { %v2644_v0 = vld [vmem:[%s3335_s0 + $0x18] sm:$0xff]  ;;  %v2643_v1 = vld [vmem:[%s3335_s0 + $0x10] sm:$0xff]  ;;  %v2642_v2 = vld [vmem:[%s3335_s0 + $0x8] sm:$0xff]  ;;  %vm738_vm0 = vcmask 523264   ;;  %vm767_vm1 = vcmask 1040384   ;;  %vm777_vm2 = vcmask 257024  }
  0x21   : > { %746 = vmatpush.bf16.msra.mxu0 %v2644_v0  ;;  %v2641_v3 = vld [vmem:[%s3335_s0] sm:$0xff] }
  0x22   : > { %v700_v4 = vld [vmem:[%s3336_s26] sm:$0x3] }
  0x23   : > { %v701_v5 = vpack.c.bf16 %v700_v4, %v700_v4  ;;  %v2690_v6 = vld [vmem:[%s3337_s5] ss:$0 sm:$0xff] }
  0x24   : > { %v2691_v7 = vld [vmem:[%s3305_s3] ss:$0 sm:$0xff] }
  0x25   : > { %747 = vmatpush.bf16.msra.mxu0 %v2643_v1  ;;  %v759_v10 = vrot.slane %v2691_v7, 1 }
  0x29   : > { %748 = vmatpush.bf16.msra.mxu0 %v2642_v2 }
  0x2d   : > { %749 = vmatpush.bf16.msra.mxu0 %v2641_v3 }
  0x30   : > { %2555 = vmatmul.msk.bf16.vlgmr.msra.gmra.mxu0 %vm738_vm0, %v701_v5 }
  0xad   : > { %v751_v8 = vpop.f32.mrf.mxu0 }
  0xae   : > { %v752_v9 = vadd.f32 %v2690_v6, %v751_v8 }
  0xb0   : > { %v762_v11 = vrot.slane %v752_v9, 1  ;;  %v763_v12 = vperm.slane %v752_v9, 0 }
  0xb2   : > { %v764_v13 = vperm.slane %v762_v11, 0  ;;  %v768_v14 = vsel %vm767_vm1, %v2691_v7, %v763_v12 }
  0xb3   : > { %772 = vst [vmem:[#allocation1] ss:$4 sm:$0xff] %v768_v14 }
  0xb4   : > { %v769_v15 = vsel %vm767_vm1, %v759_v10, %v764_v13 }
  0xb5   : > { %774 = vst [vmem:[#allocation1 + $0x1] ss:$4 sm:$0xff] %v769_v15  ;;  %v753_v16 = vpop.f32.mrf.mxu0 }
  0xbc   : > { %v775_v17 = vld.sshfl [vmem:[#allocation1] sm:$0xff pattern:$0x73625140] }
  0xbd   : > { %778 = vst.msk [vmem:[#allocation2] sm:$0xf] %vm777_vm2, %v775_v17 }
  0xbe PF: > { %v2646_v18 = vld [vmem:[%s2969_s22 + $0x8] sm:$0xff]  ;;  %v2645_v19 = vld [vmem:[%s2969_s22] sm:$0xff]  ;;  %vm801_vm3 = vcmask 261120   ;;  %s3338_s27 = scalar_lea.vmem %s3308_s6, %s2959_s29  ;;  %s2839_s21 = smov 112   ;;  %v2843_v34 = vmov 1983009808  }
  0xbf   : > { %811 = vmatpush.bf16.msra.mxu0 %v2646_v18  ;;  %v2762_v22 = vld [vmem:[%s3338_s27] ss:$0 sm:$0xff]  ;;  %s2840_s22 = smov 104   ;;  %s2841_s23 = smov 120   ;;  %v832_v35 = vunpack.c.l.s4 %v2843_v34  ;;  %vm829_vm4 = vcmask 1047556   ;;  %vm1306_vm5 = vcmask 1043456  }
  0xc0   : > { %s2842_s26 = smov 96   ;;  %v2844_v42 = vmov 1934713408   ;;  %s2845_s18 = smov 64   ;;  %vm1302_vm6 = vcmask 64512   ;;  %vm1389_vm7 = vcmask 27648  }
  0xc1   : > { %v3061_v38 = vunpack.c.0.s8 %v832_v35  ;;  %v846_v43 = vunpack.c.l.s4 %v2844_v42  ;;  %vm1762_vm8 = vcmask 31744   ;;  %s2846_s1 = smov 16   ;;  %s2847_s7 = smov 24   ;;  %vm2035_vm9 = vcmask 130048  }
  0xc2   : > { %s2848_s19 = smov 8   ;;  %vm2037_vm10 = vcmask 195584   ;;  %vm2079_vm11 = vcmask 257024   ;;  %p2623_p5 = scmp.ne.s32.totalorder %s2953_s28, 1 }
  0xc3   : > { %812 = vmatpush.bf16.msra.mxu0 %v2645_v19  ;;  %v3066_v49 = vunpack.c.0.s8 %v846_v43  ;;  %s3342_s14 = sld [smem:[#allocation14_spill]] (!%p2623_p5) }
  0xc4   : > { %v3029_v20 = vld [vmem:[#allocation2] sm:$0xf] }
  0xc5   : > { %v780_v21 = vpack.c.bf16 %v3029_v20, %v3029_v20 }
  0xc7   : > { %2564 = vmatmul.msk.bf16.vlgmr.msra.gmra.mxu0 %vm801_vm3, %v780_v21 }
 0x144   : > { %v814_v23 = vpop.f32.mrf.mxu0 }
 0x145   : > { %v3039_v24 = vadd.f32 %v2762_v22, %v814_v23 }
 0x147   : > { %822 = vrot.lane.b32.xlu1 %v3039_v24, %s2839_s21  ;;  %825 = vrot.lane.b32.xlu0 %v3039_v24, %s2840_s22  ;;  %s3339_s21 = scalar_lea.vmem %s3310_s8, %s2959_s29 }
 0x14c   : > { %v816_v25 = vpop.f32.mrf.mxu0 }
 0x14f   : > { %819 = vrot.lane.b32.xlu0 %v3039_v24, %s2841_s23 }
 0x1b9   : > { %v3044_v26 = vpop.permute.xlu1 %822  ;;  %v3046_v27 = vpop.permute.xlu0 %825 }
 0x1ba   : > { %v3050_v28 = vpack.i.bf16 %v3039_v24, %v3044_v26 }
 0x1bc   : > { %2698 = vrot.lane.b32.xlu2 %v3050_v28, %s2842_s26 }
 0x1c1   : > { %v3053_v29 = vpop.permute.xlu0 %819 }
 0x1c2   : > { %v3057_v30 = vpack.i.bf16 %v3053_v29, %v3046_v27 }
 0x1c4   : > { %2693 = vrot.lane.b32.xlu1 %v3057_v30, %s2842_s26 }
 0x216   : > { %v2699_v31 = vpop.permute.xlu2 %2698 }
 0x217   : > { %v2700_v32 = vunpack.i.l.bf16 %v2699_v31  ;;  %v2701_v36 = vunpack.i.h.bf16 %v2699_v31 }
 0x219   : > { %v869_v33 = vrot.slane %v2700_v32, 4 }
 0x21b   : > { %v870_v37 = vsel %vm829_vm4, %v869_v33, %v2701_v36 }
 0x21c   : > { %v874_v41 = vperm.slane %v870_v37, %v3061_v38 }
 0x21e   : > { %v883_v47 = vrot.slane %v874_v41, 4 }
 0x236   : > { %v2694_v39 = vpop.permute.xlu1 %2693 }
 0x237   : > { %v2695_v40 = vunpack.i.l.bf16 %v2694_v39  ;;  %v2696_v44 = vunpack.i.h.bf16 %v2694_v39 }
 0x239   : > { %v875_v45 = vrot.slane %v2695_v40, 4 }
 0x23b   : > { %v876_v46 = vsel %vm829_vm4, %v875_v45, %v2696_v44 }
 0x23c   : > { %v880_v48 = vperm.slane %v876_v46, %v3061_v38 }
 0x23e   : > { %v881_v50 = vrot.slane %v880_v48, 4  ;;  %v884_v51 = vsel %vm829_vm4, %v880_v48, %v883_v47 }
 0x23f   : > { %v892_v52 = vperm.slane %v884_v51, %v3066_v49 }
 0x240   : > { %v882_v53 = vsel %vm829_vm4, %v881_v50, %v874_v41 }
 0x241   : > { %v895_v54 = vrot.slane %v892_v52, 4  ;;  %v888_v55 = vperm.slane %v882_v53, %v3066_v49  ;;  %v899_v58 = vpack.c.bf16 %v892_v52, %v892_v52  ;;  %v828_v52 = vrot.slane %v3044_v26, 4 }
 0x243   : > { %v896_v56 = vsel %vm829_vm4, 0.0, %v895_v54  ;;  %v893_v57 = vrot.slane %v888_v55, 4  ;;  %v897_v61 = vpack.c.bf16 %v888_v55, %v888_v55  ;;  %v830_v53 = vsel %vm829_vm4, %v828_v52, %v3039_v24 }
 0x244   : > { %v900_v59 = vpack.c.bf16 %v896_v56, %v896_v56  ;;  %v835_v54 = vrot.slane %v3046_v27, 4  ;;  %v834_v56 = vperm.slane %v830_v53, %v3061_v38 }
 0x245   : > { %v894_v60 = vsel %vm829_vm4, 0.0, %v893_v57 }
 0x246   : > { %2705 = vxpose.binary.xlu0.c.b16.start.end [1/2] (short) (narrow) %v900_v59, %v899_v58, 16  ;;  %v898_v62 = vpack.c.bf16 %v894_v60, %v894_v60  ;;  %v836_v55 = vsel %vm829_vm4, %v835_v54, %v3053_v29  ;;  %v843_v59 = vrot.slane %v834_v56, 4 }
 0x247   : > { %v840_v57 = vperm.slane %v836_v55, %v3061_v38 }
 0x248   : > { %2702 = vxpose.binary.xlu2.c.b16.start.end [1/2] (short) (narrow) %v898_v62, %v897_v61, 16 }
 0x249   : > { %v841_v60 = vrot.slane %v840_v57, 4 }
 0x24b   : > { %v842_v26 = vsel %vm829_vm4, %v841_v60, %v834_v56 }
 0x24c   : > { %v848_v27 = vperm.slane %v842_v26, %v3066_v49 }
 0x2e9   : > { %v2703_v63 = vpop.trf.xlu2 }
 0x2ea   : > { %v1045_v0 = vperm.slane %v2703_v63, %v3061_v38 }
 0x2ec   : > { %v1052_v1 = vrot.slane %v1045_v0, 4 }
 0x2f1   : > { %v2704_v3 = vpop.trf.xlu2 }
 0x2f2   : > { %v2706_v2 = vpop.trf.xlu0  ;;  %v1069_v6 = vperm.slane %v2704_v3, %v3061_v38 }
 0x2f3   : > { %v1049_v4 = vperm.slane %v2706_v2, %v3061_v38 }
 0x2f4   : > { %v1076_v9 = vrot.slane %v1069_v6, 4 }
 0x2f5   : > { %v1053_v5 = vsel %vm829_vm4, %v1049_v4, %v1052_v1  ;;  %v1050_v7 = vrot.slane %v1049_v4, 4  ;;  %v853_v1 = vrot.slane %v848_v27, 4 }
 0x2f6   : > { %v1061_v8 = vperm.slane %v1053_v5, %v3066_v49 }
 0x2f7   : > { %v1051_v10 = vsel %vm829_vm4, %v1050_v7, %v1045_v0 }
 0x2f8   : > { %v1064_v13 = vrot.slane %v1061_v8, 4  ;;  %v1057_v14 = vperm.slane %v1051_v10, %v3066_v49  ;;  %v1110_v19 = vshrl.u32 %v1061_v8, 16 }
 0x2fa   : > { %v2707_v11 = vpop.trf.xlu0  ;;  %v1065_v23 = vsel %vm829_vm4, 0, %v1064_v13  ;;  %v1094_v31 = vshrl.u32 %v1057_v14, 16  ;;  %v1062_v44 = vrot.slane %v1057_v14, 4 }
 0x2fb   : > { %v1073_v12 = vperm.slane %v2707_v11, %v3061_v38  ;;  %v1118_v36 = vshrl.u32 %v1065_v23, 16 }
 0x2fc   : > { %v1063_v46 = vsel %vm829_vm4, 0, %v1062_v44 }
 0x2fd   : > { %v1074_v15 = vrot.slane %v1073_v12, 4  ;;  %v1077_v16 = vsel %vm829_vm4, %v1073_v12, %v1076_v9  ;;  %v1102_v48 = vshrl.u32 %v1063_v46, 16  ;;  %v854_v9 = vsel %vm829_vm4, 0.0, %v853_v1 }
 0x2fe   : > { %v1085_v17 = vperm.slane %v1077_v16, %v3066_v49  ;;  %v956_v16 = vpack.c.bf16 %v854_v9, %v854_v9 }
 0x2ff   : > { %v1075_v18 = vsel %vm829_vm4, %v1074_v15, %v1069_v6 }
 0x300   : > { %v1081_v21 = vperm.slane %v1075_v18, %v3066_v49  ;;  %v1111_v22 = vshrl.u32 %v1085_v17, 16  ;;  %v1088_v25 = vrot.slane %v1085_v17, 4  ;;  %v1108_v32 = vpack.i.b16 %v1085_v17, %v1061_v8 }
 0x302   : > { %v1112_v33 = vpack.i.b16 %v1111_v22, %v1110_v19  ;;  %v1095_v34 = vshrl.u32 %v1081_v21, 16  ;;  %v1089_v35 = vsel %vm829_vm4, 0, %v1088_v25  ;;  %v1092_v39 = vpack.i.b16 %v1081_v21, %v1057_v14 }
 0x303   : > { %v1119_v37 = vshrl.u32 %v1089_v35, 16  ;;  %v1116_v41 = vpack.i.b16 %v1089_v35, %v1065_v23  ;;  %v1086_v43 = vrot.slane %v1081_v21, 4  ;;  %v945_v21 = vpack.c.bf16 %v848_v27, %v848_v27 }
 0x304   : > { %2711 = vxpose.binary.xlu0.c.b16.start.end [1/2] (short) (narrow) %v1112_v33, %v1108_v32, 16  ;;  %v1096_v40 = vpack.i.b16 %v1095_v34, %v1094_v31 }
 0x305   : > { %v1120_v42 = vpack.i.b16 %v1119_v37, %v1118_v36  ;;  %v1087_v45 = vsel %vm829_vm4, 0, %v1086_v43 }
 0x306   : > { %2714 = vxpose.binary.xlu2.c.b16.start.end [1/2] (short) (narrow) %v1096_v40, %v1092_v39, 16  ;;  %v1103_v47 = vshrl.u32 %v1087_v45, 16  ;;  %v1100_v50 = vpack.i.b16 %v1087_v45, %v1063_v46 }
 0x307   : > { %2708 = vxpose.binary.xlu1.c.b16.start.end [1/2] (short) (narrow) %v1120_v42, %v1116_v41, 16 }
 0x308   : > { %v1104_v51 = vpack.i.b16 %v1103_v47, %v1102_v48 }
 0x316   : > { %2727 = vxpose.binary.xlu2.c.b16.start.end [1/2] (short) (narrow) %v1104_v51, %v1100_v50, 16 }
 0x361   : > { %2723 = vrot.lane.b32.xlu1 %v3050_v28, %s2845_s18  ;;  %v844_v28 = vsel %vm829_vm4, %v840_v57, %v843_v59 }
 0x372   : > { %2718 = vrot.lane.b32.xlu0 %v3057_v30, %s2845_s18  ;;  %v852_v30 = vperm.slane %v844_v28, %v3066_v49  ;;  %s3340_s18 = sld [smem:[#allocation12_spill]] (!%p2623_p5) }
 0x374   : > { %v855_v62 = vrot.slane %v852_v30, 4  ;;  %v946_v10 = vpack.c.bf16 %v852_v30, %v852_v30 }
 0x376   : > { %v856_v2 = vsel %vm829_vm4, 0.0, %v855_v62  ;;  %v947_v19 = vrot.slane %v946_v10, 4 }
 0x377   : > { %v957_v4 = vpack.c.bf16 %v856_v2, %v856_v2  ;;  %v1384_v2 = vld [vmem:[%s3306_s4] sm:$0xf] }
 0x378   : > { %v949_v34 = vsel %vm829_vm4, %v947_v19, %v945_v21 }
 0x379   : > { %v958_v17 = vrot.slane %v957_v4, 4  ;;  %v953_v41 = vperm.slane %v949_v34, %v3066_v49 }
 0x37b   : > { %v959_v32 = vsel %vm829_vm4, %v958_v17, %v956_v16  ;;  %v954_v50 = vrot.slane %v953_v41, 4  ;;  %v969_v60 = vshrl.u32 %v953_v41, 16 }
 0x37c   : > { %v963_v37 = vperm.slane %v959_v32, %v3066_v49 }
 0x37e   : > { %v964_v44 = vrot.slane %v963_v37, 4  ;;  %v970_v54 = vshrl.u32 %v963_v37, 16  ;;  %v968_v59 = vpack.i.b16 %v963_v37, %v953_v41 }
 0x380   : > { %v965_v28 = vsel %vm829_vm4, 0, %v964_v44 }
 0x3a7   : > { %v2715_v58 = vpop.trf.xlu2 }
 0x3af   : > { %v2716_v61 = vpop.trf.xlu2 }
 0x3b0   : > { %v2712_v24 = vpop.trf.xlu0 }
 0x3b1   : > { %v1250_v29 = vrot.slane %v2712_v24, 4  ;;  %v955_v24 = vsel %vm829_vm4, 0, %v954_v50 }
 0x3b2   : > { %v974_v62 = vpack.i.b16 %v965_v28, %v955_v24 }
 0x3b3   : > { %v2709_v63 = vpop.trf.xlu1  ;;  %v1251_v5 = vsel %vm829_vm4, %v1250_v29, %v2715_v58  ;;  %v975_v29 = vshrl.u32 %v955_v24, 16 }
 0x3b4   : > { %v1256_v0 = vrot.slane %v2709_v63, 4  ;;  %v1255_v11 = vperm.slane %v1251_v5, %v3061_v38  ;;  %v976_v63 = vshrl.u32 %v965_v28, 16 }
 0x3b7   : > { %v2728_v3 = vpop.trf.xlu2 }
 0x3b8   : > { %v1257_v6 = vsel %vm829_vm4, %v1256_v0, %v2728_v3  ;;  %v2713_v8 = vpop.trf.xlu0  ;;  %v977_v0 = vpack.i.b16 %v976_v63, %v975_v29 }
 0x3b9   : > { %v1261_v7 = vperm.slane %v1257_v6, %v3061_v38  ;;  %v1270_v14 = vrot.slane %v2713_v8, 4 }
 0x3bb   : > { %v1262_v12 = vrot.slane %v1261_v7, 4  ;;  %v2710_v13 = vpop.trf.xlu1  ;;  %v1271_v23 = vsel %vm829_vm4, %v1270_v14, %v2716_v61  ;;  %v971_v61 = vpack.i.b16 %v970_v54, %v969_v60 }
 0x3bc   : > { %v1276_v15 = vrot.slane %v2710_v13, 4  ;;  %v1275_v35 = vperm.slane %v1271_v23, %v3061_v38 }
 0x3bd   : > { %v1263_v18 = vsel %vm829_vm4, %v1262_v12, %v1255_v11 }
 0x3be   : > { %v1267_v31 = vperm.slane %v1263_v18, %v3066_v49 }
 0x3bf   : > { %v2729_v22 = vpop.trf.xlu2 }
 0x3c0   : > { %v1277_v25 = vsel %vm829_vm4, %v1276_v15, %v2729_v22  ;;  %v1268_v39 = vrot.slane %v1267_v31, 4  ;;  %v1293_v43 = vshrl.u32 %v1267_v31, 16 }
 0x3c1   : > { %v1281_v33 = vperm.slane %v1277_v25, %v3061_v38 }
 0x3c2   : > { %v1269_v47 = vsel %vm829_vm4, 0, %v1268_v39 }
 0x3c3   : > { %v1282_v36 = vrot.slane %v1281_v33, 4  ;;  %v1299_v56 = vshrl.u32 %v1269_v47, 16 }
 0x3c5   : > { %v1283_v40 = vsel %vm829_vm4, %v1282_v36, %v1275_v35 }
 0x3c6   : > { %v1287_v42 = vperm.slane %v1283_v40, %v3066_v49 }
 0x3c8   : > { %v1292_v45 = vpack.i.b16 %v1287_v42, %v1267_v31  ;;  %v1294_v46 = vshrl.u32 %v1287_v42, 16  ;;  %v1288_v48 = vrot.slane %v1287_v42, 4 }
 0x3ca   : > { %v1308_v51 = vsel %vm1306_vm5, %v1292_v45, 0  ;;  %v1295_v52 = vpack.i.b16 %v1294_v46, %v1293_v43  ;;  %v1289_v53 = vsel %vm829_vm4, 0, %v1288_v48 }
 0x3cb   : > { %1317 = vmatpush.bf16.msra.mxu1 %v1308_v51  ;;  %v1298_v55 = vpack.i.b16 %v1289_v53, %v1269_v47  ;;  %v1300_v57 = vshrl.u32 %v1289_v53, 16 }
 0x3cc   : > { %v1327_v58 = vsel %vm1306_vm5, %v1295_v52, 0 }
 0x3cd   : > { %1336 = vmatpush.bf16.msra.mxu2 %v1327_v58  ;;  %v1346_v30 = vsel %vm1306_vm5, %v1298_v55, 0  ;;  %v1301_v26 = vpack.i.b16 %v1300_v57, %v1299_v56 }
 0x3ce   : > { %2565 = vmatmul.msk.bf16.vlgmr.msra.gmra.mxu1 %vm1302_vm6, %v968_v59  ;;  %1355 = vmatpush.bf16.msra.mxu3 %v1346_v30 }
 0x3cf   : > { %v1365_v27 = vsel %vm1306_vm5, %v1301_v26, 0 }
 0x3d0   : > { %2566 = vmatmul.msk.bf16.vlgmr.msra.gmra.mxu2 %vm1302_vm6, %v971_v61  ;;  %1374 = vmatpush.bf16.msrb.mxu1 %v1365_v27 }
 0x3d1   : > { %2567 = vmatmul.msk.bf16.vlgmr.msra.gmra.mxu3 %vm1302_vm6, %v974_v62 }
 0x3d3   : > { %v2724_v25 = vpop.permute.xlu1 %2723 }
 0x3d4   : > { %v2725_v32 = vunpack.i.l.bf16 %v2724_v25  ;;  %v2726_v36 = vunpack.i.h.bf16 %v2724_v25 }
 0x3d6   : > { %v913_v34 = vrot.slane %v2725_v32, 4 }
 0x3d8   : > { %v914_v39 = vsel %vm829_vm4, %v913_v34, %v2726_v36 }
 0x3d9   : > { %v918_v41 = vperm.slane %v914_v39, %v3061_v38 }
 0x3db   : > { %v927_v43 = vrot.slane %v918_v41, 4 }
 0x3de   : > { %2568 = vmatmul.msk.bf16.vlgmr.msrb.gmra.mxu1 %vm1302_vm6, %v977_v0 }
 0x3e4   : > { %v2719_v23 = vpop.permute.xlu0 %2718 }
 0x3e5   : > { %v2720_v31 = vunpack.i.l.bf16 %v2719_v23  ;;  %v2721_v35 = vunpack.i.h.bf16 %v2719_v23 }
 0x3e7   : > { %v919_v33 = vrot.slane %v2720_v31, 4 }
 0x3e9   : > { %v920_v37 = vsel %vm829_vm4, %v919_v33, %v2721_v35 }
 0x3ea   : > { %v924_v40 = vperm.slane %v920_v37, %v3061_v38 }
 0x3ec   : > { %v925_v42 = vrot.slane %v924_v40, 4  ;;  %v928_v44 = vsel %vm829_vm4, %v924_v40, %v927_v43 }
 0x3ed   : > { %v936_v46 = vperm.slane %v928_v44, %v3066_v49 }
 0x3ee   : > { %v926_v45 = vsel %vm829_vm4, %v925_v42, %v918_v41 }
 0x3ef   : > { %v932_v47 = vperm.slane %v926_v45, %v3066_v49  ;;  %v939_v48 = vrot.slane %v936_v46, 4  ;;  %v943_v53 = vpack.c.bf16 %v936_v46, %v936_v46 }
 0x3f1   : > { %v937_v50 = vrot.slane %v932_v47, 4  ;;  %v940_v51 = vsel %vm829_vm4, 0.0, %v939_v48  ;;  %v941_v55 = vpack.c.bf16 %v932_v47, %v932_v47 }
 0x3f2   : > { %v944_v54 = vpack.c.bf16 %v940_v51, %v940_v51 }
 0x3f3   : > { %v938_v52 = vsel %vm829_vm4, 0.0, %v937_v50 }
 0x3f4   : > { %v942_v56 = vpack.c.bf16 %v938_v52, %v938_v52 }
 0x44b   : > { %v1319_v1 = vpop.f32.mrf.mxu1 }
 0x44c   : > { %v1380_v3 = vmul.f32 0.35355338, %v1319_v1 }
 0x44e   : > { %v1385_v4 = vadd.f32 %v1384_v2, %v1380_v3 }
 0x450   : > { %v1390_v5 = vsel %vm1389_vm7, %v1385_v4, -inf }
 0x451   : > { %1391 = vmax.xlane.f32.xlu1 %v1390_v5 }
 0x453   : > { %v1321_v6 = vpop.f32.mrf.mxu1  ;;  %v1338_v7 = vpop.f32.mrf.mxu2 }
 0x454   : > { %v1381_v8 = vmul.f32 0.35355338, %v1338_v7  ;;  %v1357_v9 = vpop.f32.mrf.mxu3 }
 0x455   : > { %v1382_v10 = vmul.f32 0.35355338, %v1357_v9 }
 0x456   : > { %v1386_v11 = vadd.f32 %v1384_v2, %v1381_v8 }
 0x457   : > { %v1387_v12 = vadd.f32 %v1384_v2, %v1382_v10 }
 0x458   : > { %v1393_v13 = vsel %vm1389_vm7, %v1386_v11, -inf }
 0x459   : > { %1394 = vmax.xlane.f32.xlu0 %v1393_v13  ;;  %v1396_v14 = vsel %vm1389_vm7, %v1387_v12, -inf }
 0x45a   : > { %1397 = vmax.xlane.f32.xlu2 %v1396_v14 }
 0x45b   : > { %v1340_v15 = vpop.f32.mrf.mxu2  ;;  %v1376_v16 = vpop.f32.mrf.mxu1 }
 0x45c   : > { %v1383_v17 = vmul.f32 0.35355338, %v1376_v16  ;;  %v1359_v18 = vpop.f32.mrf.mxu3 }
 0x45e   : > { %v1388_v19 = vadd.f32 %v1384_v2, %v1383_v17 }
 0x460   : > { %v1399_v21 = vsel %vm1389_vm7, %v1388_v19, -inf }
 0x462   : > { %1400 = vmax.xlane.f32.xlu2 %v1399_v21 }
 0x463   : > { %v1378_v22 = vpop.f32.mrf.mxu1 }
 0x48b   : > { %2733 = vxpose.binary.xlu1.c.b16.start.end [1/2] (short) (narrow) %v944_v54, %v943_v53, 16 }
 0x48c   : > { %2730 = vxpose.binary.xlu2.c.b16.start.end [1/2] (short) (narrow) %v942_v56, %v941_v55, 16 }
 0x4c4   : > { %v1392_v57 = vpop.xlane.xlu1 %1391 }
 0x4c5   : > { %v1402_v58 = vsub.f32 %v1385_v4, %v1392_v57 }
 0x4c7   : > { %v1406_v59 = vmul.f32 1.442695, %v1402_v58 }
 0x4c9   : > { %2770 = vpow2.f32 %v1406_v59 }
 0x4cc   : > { %v1395_v60 = vpop.xlane.xlu0 %1394 }
 0x4cd   : > { %v1403_v28 = vsub.f32 %v1386_v11, %v1395_v60  ;;  %v1398_v30 = vpop.xlane.xlu2 %1397 }
 0x4ce   : > { %v1404_v24 = vsub.f32 %v1387_v12, %v1398_v30 }
 0x4cf   : > { %v2771_v26 = vpop.eup %2770  ;;  %v1408_v61 = vmul.f32 1.442695, %v1403_v28 }
 0x4d0   : > { %v1414_v27 = vsel %vm1389_vm7, %v2771_v26, 0.0  ;;  %v1410_v62 = vmul.f32 1.442695, %v1404_v24 }
 0x4d1   : > { %2772 = vpow2.f32 %v1408_v61  ;;  %1415 = vadd.xlane.f32.xlu0 %v1414_v27 }
 0x4d2   : > { %2774 = vpow2.f32 %v1410_v62 }
 0x4d5   : > { %v1401_v2 = vpop.xlane.xlu2 %1400 }
 0x4d6   : > { %v1405_v3 = vsub.f32 %v1388_v19, %v1401_v2 }
 0x4d7   : > { %v3152_v63 = vpop.eup %2772 }
 0x4d8   : > { %v1417_v29 = vsel %vm1389_vm7, %v3152_v63, 0.0  ;;  %v3156_v0 = vpop.eup %2774  ;;  %v1412_v4 = vmul.f32 1.442695, %v1405_v3 }
 0x4d9   : > { %1418 = vadd.xlane.f32.xlu0 %v1417_v29  ;;  %v1420_v1 = vsel %vm1389_vm7, %v3156_v0, 0.0 }
 0x4da   : > { %2776 = vpow2.f32 %v1412_v4 }
 0x4e0   : > { %v3160_v5 = vpop.eup %2776 }
 0x4e1   : > { %1421 = vadd.xlane.f32.xlu0 %v1420_v1  ;;  %v1423_v6 = vsel %vm1389_vm7, %v3160_v5, 0.0 }
 0x4fd   : > { %1424 = vadd.xlane.f32.xlu2 %v1423_v6 }
 0x52d   : > { %v2731_v7 = vpop.trf.xlu2 }
 0x52e   : > { %v1505_v8 = vperm.slane %v2731_v7, %v3061_v38 }
 0x530   : > { %v1512_v9 = vrot.slane %v1505_v8, 4 }
 0x535   : > { %v2732_v11 = vpop.trf.xlu2 }
 0x536   : > { %v1529_v15 = vperm.slane %v2732_v11, %v3061_v38 }
 0x537   : > { %v2734_v10 = vpop.trf.xlu1 }
 0x538   : > { %v1509_v12 = vperm.slane %v2734_v10, %v3061_v38  ;;  %v1536_v18 = vrot.slane %v1529_v15, 4 }
 0x53a   : > { %v1510_v13 = vrot.slane %v1509_v12, 4  ;;  %v1513_v14 = vsel %vm829_vm4, %v1509_v12, %v1512_v9 }
 0x53b   : > { %v1521_v17 = vperm.slane %v1513_v14, %v3066_v49 }
 0x53c   : > { %v1511_v16 = vsel %vm829_vm4, %v1510_v13, %v1505_v8 }
 0x53d   : > { %v1517_v19 = vperm.slane %v1511_v16, %v3066_v49  ;;  %v1524_v23 = vrot.slane %v1521_v17, 4  ;;  %v1570_v29 = vshrl.u32 %v1521_v17, 16 }
 0x53f   : > { %v2735_v21 = vpop.trf.xlu1  ;;  %v1522_v33 = vrot.slane %v1517_v19, 4  ;;  %v1525_v37 = vsel %vm829_vm4, 0, %v1524_v23  ;;  %v1554_v24 = vshrl.u32 %v1517_v19, 16 }
 0x540   : > { %v1533_v22 = vperm.slane %v2735_v21, %v3061_v38  ;;  %v1578_v43 = vshrl.u32 %v1525_v37, 16 }
 0x541   : > { %v1523_v41 = vsel %vm829_vm4, 0, %v1522_v33 }
 0x542   : > { %v1534_v25 = vrot.slane %v1533_v22, 4  ;;  %v1537_v31 = vsel %vm829_vm4, %v1533_v22, %v1536_v18  ;;  %v1562_v48 = vshrl.u32 %v1523_v41, 16 }
 0x543   : > { %v1545_v32 = vperm.slane %v1537_v31, %v3066_v49 }
 0x544   : > { %v1535_v34 = vsel %vm829_vm4, %v1534_v25, %v1529_v15  ;;  %v1416_v35 = vpop.xlane.xlu0 %1415 }
 0x545   : > { %v1541_v36 = vperm.slane %v1535_v34, %v3066_v49  ;;  %2778 = vrcp.f32 %v1416_v35  ;;  %v1548_v39 = vrot.slane %v1545_v32, 4  ;;  %v1571_v27 = vshrl.u32 %v1545_v32, 16 }
 0x546   : > { %v1568_v2 = vpack.i.b16 %v1545_v32, %v1521_v17 }
 0x547   : > { %v1549_v40 = vsel %vm829_vm4, 0, %v1548_v39  ;;  %v1546_v42 = vrot.slane %v1541_v36, 4  ;;  %v1555_v30 = vshrl.u32 %v1541_v36, 16  ;;  %v1572_v3 = vpack.i.b16 %v1571_v27, %v1570_v29 }
 0x548   : > { %v1579_v44 = vshrl.u32 %v1549_v40, 16  ;;  %v1576_v46 = vpack.i.b16 %v1549_v40, %v1525_v37 }
 0x549   : > { %v1547_v45 = vsel %vm829_vm4, 0, %v1546_v42  ;;  %v1556_v62 = vpack.i.b16 %v1555_v30, %v1554_v24 }
 0x54a   : > { %v1580_v47 = vpack.i.b16 %v1579_v44, %v1578_v43  ;;  %v1563_v50 = vshrl.u32 %v1547_v45, 16  ;;  %v1560_v53 = vpack.i.b16 %v1547_v45, %v1523_v41 }
 0x54b   : > { %v2779_v51 = vpop.eup %2778 }
 0x54c   : > { %v1419_v52 = vpop.xlane.xlu0 %1418  ;;  %2736 = vxpose.binary.xlu0.c.b16.start.end [1/2] (short) (narrow) %v1580_v47, %v1576_v46, 16  ;;  %v1564_v54 = vpack.i.b16 %v1563_v50, %v1562_v48  ;;  %v1430_v55 = vmul.f32 %v2779_v51, %v2771_v26  ;;  %v1552_v26 = vpack.i.b16 %v1541_v36, %v1517_v19 }
 0x54d   : > { %2780 = vrcp.f32 %v1419_v52 }
 0x54e   : > { %2739 = vxpose.binary.xlu1.c.b16.start.end [1/2] (short) (narrow) %v1564_v54, %v1560_v53, 16  ;;  %v1434_v56 = vpack.c.bf16 %v1430_v55, %v1430_v55 }
 0x550   : > { %v1767_v57 = vsel %vm1762_vm8, %v1434_v56, 0 }
 0x551   : > { %1776 = vmatpush.bf16.xpose.msrb.mxu2 %v1767_v57 }
 0x553   : > { %v2781_v58 = vpop.eup %2780 }
 0x554   : > { %v1422_v59 = vpop.xlane.xlu0 %1421  ;;  %v1431_v60 = vmul.f32 %v2781_v58, %v3152_v63 }
 0x555   : > { %2782 = vrcp.f32 %v1422_v59 }
 0x556   : > { %v1435_v28 = vpack.c.bf16 %v1431_v60, %v1431_v60 }
 0x558   : > { %v1786_v61 = vsel %vm1762_vm8, %v1435_v28, 0 }
 0x559   : > { %1795 = vmatpush.bf16.xpose.msrb.mxu3 %v1786_v61 }
 0x55b   : > { %v2783_v1 = vpop.eup %2782 }
 0x55c   : > { %2745 = vxpose.binary.xlu0.c.b16.start.end [1/2] (short) (narrow) %v1556_v62, %v1552_v26, 16  ;;  %v1432_v4 = vmul.f32 %v2783_v1, %v3156_v0 }
 0x55e   : > { %2742 = vxpose.binary.xlu1.c.b16.start.end [1/2] (short) (narrow) %v1572_v3, %v1568_v2, 16  ;;  %v1436_v6 = vpack.c.bf16 %v1432_v4, %v1432_v4 }
 0x560   : > { %v1805_v63 = vsel %vm1762_vm8, %v1436_v6, 0 }
 0x561   : > { %1814 = vmatpush.bf16.xpose.msra.mxu1 %v1805_v63 }
 0x570   : > { %v1425_v7 = vpop.xlane.xlu2 %1424 }
 0x571   : > { %2784 = vrcp.f32 %v1425_v7 }
 0x577   : > { %v2785_v8 = vpop.eup %2784 }
 0x578   : > { %v1433_v9 = vmul.f32 %v2785_v8, %v3160_v5 }
 0x57a   : > { %v1437_v10 = vpack.c.bf16 %v1433_v9, %v1433_v9 }
 0x57c   : > { %v1824_v11 = vsel %vm1762_vm8, %v1437_v10, 0 }
 0x57d   : > { %1833 = vmatpush.bf16.xpose.msrb.mxu1 %v1824_v11 }
 0x5f8   : > { %v2737_v12 = vpop.trf.xlu0 }
 0x5f9   : > { %v1716_v16 = vrot.slane %v2737_v12, 4 }
 0x5fa   : > { %v2740_v13 = vpop.trf.xlu1 }
 0x5fb   : > { %v1717_v17 = vsel %vm829_vm4, %v1716_v16, %v2740_v13 }
 0x5fc   : > { %v1721_v22 = vperm.slane %v1717_v17, %v3061_v38 }
 0x5fe   : > { %v1722_v31 = vrot.slane %v1721_v22, 4 }
 0x600   : > { %v2738_v14 = vpop.trf.xlu0 }
 0x601   : > { %v1736_v19 = vrot.slane %v2738_v14, 4 }
 0x602   : > { %v2741_v15 = vpop.trf.xlu1 }
 0x603   : > { %v1737_v25 = vsel %vm829_vm4, %v1736_v19, %v2741_v15 }
 0x604   : > { %v1741_v32 = vperm.slane %v1737_v25, %v3061_v38 }
 0x606   : > { %v1742_v40 = vrot.slane %v1741_v32, 4 }
 0x608   : > { %v2746_v0 = vpop.trf.xlu0 }
 0x60a   : > { %v2743_v18 = vpop.trf.xlu1 }
 0x60b   : > { %v1710_v21 = vrot.slane %v2743_v18, 4 }
 0x60d   : > { %v1711_v23 = vsel %vm829_vm4, %v1710_v21, %v2746_v0 }
 0x60e   : > { %v1715_v5 = vperm.slane %v1711_v23, %v3061_v38 }
 0x610   : > { %v1723_v33 = vsel %vm829_vm4, %v1722_v31, %v1715_v5  ;;  %v2747_v35 = vpop.trf.xlu0 }
 0x611   : > { %v1727_v37 = vperm.slane %v1723_v33, %v3066_v49 }
 0x612   : > { %v2744_v34 = vpop.trf.xlu1 }
 0x613   : > { %v1730_v36 = vrot.slane %v2744_v34, 4  ;;  %v1728_v43 = vrot.slane %v1727_v37, 4  ;;  %v1753_v47 = vshrl.u32 %v1727_v37, 16 }
 0x615   : > { %v1731_v39 = vsel %vm829_vm4, %v1730_v36, %v2747_v35  ;;  %v1729_v51 = vsel %vm829_vm4, 0, %v1728_v43 }
 0x616   : > { %v1735_v41 = vperm.slane %v1731_v39, %v3061_v38  ;;  %v1759_v55 = vshrl.u32 %v1729_v51, 16 }
 0x618   : > { %v1743_v42 = vsel %vm829_vm4, %v1742_v40, %v1735_v41  ;;  %v2648_v41 = vld [vmem:[%s2974_s24 + $0x8] sm:$0xff] }
 0x619   : > { %v1747_v44 = vperm.slane %v1743_v42, %v3066_v49  ;;  %2069 = vmatpush.bf16.msra.mxu2 %v2648_v41  ;;  %v2647_v42 = vld [vmem:[%s2974_s24] sm:$0xff] }
 0x61b   : > { %v1748_v45 = vrot.slane %v1747_v44, 4  ;;  %v1752_v46 = vpack.i.b16 %v1747_v44, %v1727_v37  ;;  %v1754_v48 = vshrl.u32 %v1747_v44, 16 }
 0x61d   : > { %2569 = vmatmul.msk.bf16.vlgmr.msrb.gmra.mxu2 %vm1762_vm8, %v1752_v46  ;;  %v1755_v50 = vpack.i.b16 %v1754_v48, %v1753_v47  ;;  %v1749_v52 = vsel %vm829_vm4, 0, %v1748_v45 }
 0x61e   : > { %v1758_v53 = vpack.i.b16 %v1749_v52, %v1729_v51  ;;  %v1760_v54 = vshrl.u32 %v1749_v52, 16  ;;  %2070 = vmatpush.bf16.msra.mxu2 %v2647_v42 }
 0x61f   : > { %2570 = vmatmul.msk.bf16.vlgmr.msrb.gmra.mxu3 %vm1762_vm8, %v1755_v50  ;;  %v2763_v50 = vld [vmem:[%s3339_s21] ss:$0 sm:$0xff] }
 0x620   : > { %2571 = vmatmul.msk.bf16.vlgmr.msra.gmra.mxu1 %vm1762_vm8, %v1758_v53  ;;  %v1761_v56 = vpack.i.b16 %v1760_v54, %v1759_v55 }
 0x630   : > { %2572 = vmatmul.msk.bf16.vlgmr.msrb.gmra.mxu1 %vm1762_vm8, %v1761_v56  ;;  %v2849_v56 = vmov 32.0  }
 0x631   : > { %2786 = vrcp.f32 %v2849_v56 }
 0x69d   : > { %v1816_v57 = vpop.f32.mrf.mxu1 }
 0x6a0   : > { %v1778_v58 = vpop.f32.mrf.mxu2 }
 0x6a1   : > { %v2748_v59 = vpack.i.bf16 %v1778_v58, %v1816_v57  ;;  %v2787_v57 = vpop.eup %2786 }
 0x6a2   : > { %v1797_v60 = vpop.f32.mrf.mxu3  ;;  %v2084_v58 = vmul.f32 32.0, %v2787_v57  ;;  %vm2088_vm12 = vweird.f32 %v2787_v57 }
 0x6a3   : > { %2749 = vxpose.xlu1.b32.start.end [1/1] (short) (narrow) %v2748_v59, 8 }
 0x6a4   : > { %v2085_v59 = vsub.f32 1.0, %v2084_v58 }
 0x6a5   : > { %v1818_v28 = vpop.f32.mrf.mxu1 }
 0x6a8   : > { %v1780_v30 = vpop.f32.mrf.mxu2 }
 0x6aa   : > { %v1799_v61 = vpop.f32.mrf.mxu3 }
 0x6ad   : > { %v1835_v24 = vpop.f32.mrf.mxu1 }
 0x6ae   : > { %v2755_v27 = vpack.i.bf16 %v1797_v60, %v1835_v24  ;;  %v2086_v60 = vmul.f32 %v2787_v57, %v2085_v59 }
 0x6b0   : > { %2756 = vxpose.xlu0.b32.start.end [1/1] (short) (narrow) %v2755_v27, 8  ;;  %v2087_v28 = vadd.f32 %v2787_v57, %v2086_v60 }
 0x6b2   : > { %v3236_v30 = vsel %vm2088_vm12, %v2787_v57, %v2087_v28 }
 0x6b5   : > { %v1837_v26 = vpop.f32.mrf.mxu1 }
 0x747   : > { %v2750_v62 = vpop.trf.xlu1 }
 0x748   : > { %v2751_v29 = vunpack.i.l.bf16 %v2750_v62  ;;  %v2754_v1 = vunpack.i.h.bf16 %v2750_v62  ;;  %v2650_v62 = vld [vmem:[%s2983_s15 + $0x8] sm:$0xff] }
 0x749   : > { %2143 = vmatpush.bf16.msra.mxu3 %v2650_v62 }
 0x74a   : > { %v1967_v2 = vrot.slane %v2751_v29, 4  ;;  %v2649_v29 = vld [vmem:[%s2983_s15] sm:$0xff] }
 0x74c   : > { %v1968_v3 = vsel %vm829_vm4, %v1967_v2, %v2754_v1  ;;  %v2658_v1 = vld [vmem:[%s2993_s2 + $0x38] sm:$0xff] }
 0x74d   : > { %v1972_v63 = vperm.slane %v1968_v3, %v3061_v38  ;;  %2144 = vmatpush.bf16.msra.mxu3 %v2649_v29  ;;  %2228 = vmatpush.bf16.msrb.mxu0 %v2658_v1 }
 0x74f   : > { %v1981_v10 = vrot.slane %v1972_v63, 4 }
 0x754   : > { %v2757_v4 = vpop.trf.xlu0 }
 0x755   : > { %v2758_v6 = vunpack.i.l.bf16 %v2757_v4  ;;  %v2761_v7 = vunpack.i.h.bf16 %v2757_v4  ;;  %v2657_v4 = vld [vmem:[%s2993_s2 + $0x30] sm:$0xff] }
 0x756   : > { %2229 = vmatpush.bf16.msrb.mxu0 %v2657_v4 }
 0x757   : > { %v1973_v8 = vrot.slane %v2758_v6, 4 }
 0x759   : > { %v1974_v9 = vsel %vm829_vm4, %v1973_v8, %v2761_v7 }
 0x75a   : > { %v1978_v11 = vperm.slane %v1974_v9, %v3061_v38 }
 0x75c   : > { %v1979_v12 = vrot.slane %v1978_v11, 4  ;;  %v1982_v13 = vsel %vm829_vm4, %v1978_v11, %v1981_v10 }
 0x75d   : > { %v1990_v14 = vperm.slane %v1982_v13, %v3066_v49 }
 0x75e   : > { %v1980_v15 = vsel %vm829_vm4, %v1979_v12, %v1972_v63  ;;  %v2764_v12 = vld [vmem:[%s3003_s17] ss:$0 sm:$0xff] }
 0x75f   : > { %v1986_v16 = vperm.slane %v1980_v15, %v3066_v49  ;;  %v1993_v0 = vrot.slane %v1990_v14, 4  ;;  %v2765_v14 = vld [vmem:[%s3003_s17 + $0x1] ss:$0 sm:$0xff] }
 0x761   : > { %v1991_v17 = vrot.slane %v1986_v16, 4  ;;  %v1994_v18 = vsel %vm829_vm4, 0.0, %v1993_v0  ;;  %v1995_v19 = vsel %vm829_vm4, %v1993_v0, %v1986_v16 }
 0x762   : > { %v1999_v21 = vperm.slane %v1995_v19, %v3061_v38  ;;  %v2000_v22 = vrot.slane %v1994_v18, 4  ;;  %v2656_v18 = vld [vmem:[%s2993_s2 + $0x28] sm:$0xff]  ;;  %v2655_v19 = vld [vmem:[%s2993_s2 + $0x20] sm:$0xff] }
 0x763   : > { %v1992_v23 = vsel %vm829_vm4, 0.0, %v1991_v17  ;;  %2230 = vmatpush.bf16.msrb.mxu0 %v2656_v18 }
 0x764   : > { %v2001_v5 = vsel %vm829_vm4, %v2000_v22, %v1992_v23  ;;  %v2008_v25 = vrot.slane %v1999_v21, 4  ;;  %v2653_v22 = vld [vmem:[%s2993_s2 + $0x10] sm:$0xff]  ;;  %v2652_v23 = vld [vmem:[%s2993_s2 + $0x8] sm:$0xff] }
 0x765   : > { %v2005_v31 = vperm.slane %v2001_v5, %v3061_v38  ;;  %v2651_v5 = vld [vmem:[%s2993_s2] sm:$0xff] }
 0x767   : > { %v2009_v32 = vsel %vm829_vm4, %v2005_v31, %v2008_v25  ;;  %v2006_v33 = vrot.slane %v2005_v31, 4  ;;  %2231 = vmatpush.bf16.msrb.mxu0 %v2655_v19  ;;  %v2766_v25 = vld [vmem:[%s682_s20] ss:$0 sm:$0xff] }
 0x768   : > { %v2017_v34 = vperm.slane %v2009_v32, %v3066_v49 }
 0x769   : > { %v2007_v35 = vsel %vm829_vm4, %v2006_v33, %v1999_v21  ;;  %v2654_v21 = vld [vmem:[%s2993_s2 + $0x18] sm:$0xff] }
 0x76a   : > { %2027 = vrot.lane.b32.xlu0 %v2017_v34, %s2846_s1  ;;  %v2020_v36 = vrot.slane %v2017_v34, 4  ;;  %v2013_v37 = vperm.slane %v2007_v35, %v3066_v49  ;;  %s3341_s1 = sld [smem:[#allocation13_spill]] (!%p2623_p5) }
 0x76b   : > { %2232 = vmatpush.bf16.msrb.mxu0 %v2654_v21 }
 0x76c   : > { %v2021_v39 = vsel %vm829_vm4, 0.0, %v2020_v36  ;;  %v2018_v40 = vrot.slane %v2013_v37, 4 }
 0x76d   : > { %2031 = vrot.lane.b32.xlu2 %v2021_v39, %s2847_s7 }
 0x76e   : > { %v2019_v38 = vsel %vm829_vm4, 0.0, %v2018_v40 }
 0x76f   : > { %2023 = vrot.lane.b32.xlu1 %v2019_v38, %s2848_s19  ;;  %2233 = vmatpush.bf16.msrb.mxu0 %v2653_v22 }
 0x773   : > { %2234 = vmatpush.bf16.msrb.mxu0 %v2652_v23 }
 0x777   : > { %2235 = vmatpush.bf16.msrb.mxu0 %v2651_v5 }
 0x7c7   : > { %v2032_v45 = vpop.permute.xlu2 %2031 }
 0x7dc   : > { %v2028_v44 = vpop.permute.xlu0 %2027 }
 0x7e1   : > { %v2024_v43 = vpop.permute.xlu1 %2023 }
 0x7e2   : > { %v2034_v49 = vsel %vm1302_vm6, %v2013_v37, %v2024_v43 }
 0x7e3   : > { %v2036_v46 = vsel %vm2035_vm9, %v2034_v49, %v2028_v44  ;;  %v2767_v44 = vld [vmem:[%s690_s25] ss:$0 sm:$0xff] }
 0x7e4   : > { %v2038_v47 = vsel %vm2037_vm10, %v2036_v46, %v2032_v45 }
 0x7e5   : > { %v2039_v48 = vpack.c.bf16 %v2038_v47, %v2038_v47 }
 0x7e7   : > { %2581 = vmatmul.msk.bf16.vlgmr.msra.gmra.mxu2 %vm801_vm3, %v2039_v48 }
 0x86a   : > { %v2072_v51 = vpop.f32.mrf.mxu2 }
 0x86b   : > { %v2073_v52 = vadd.f32 %v2763_v50, %v2072_v51 }
 0x86d   : > { %v2076_v53 = vadd.f32 %v2073_v52, %v3029_v20 }
 0x86f   : > { %v2080_v54 = vsel %vm2079_vm11, %v2076_v53, 0.0 }
 0x870   : > { %2081 = vadd.xlane.f32.xlu2 %v2080_v54 }
 0x872   : > { %v2074_v55 = vpop.f32.mrf.mxu2 }
 0x8e3   : > { %v2082_v61 = vpop.xlane.xlu2 %2081 }
 0x8e4   : > { %v2090_v20 = vmul.f32 %v3236_v30, %v2082_v61 }
 0x8e6   : > { %v2091_v24 = vsub.f32 %v2076_v53, %v2090_v20 }
 0x8e8   : > { %v2092_v27 = vmul.f32 %v2091_v24, %v2091_v24 }
 0x8ea   : > { %v2093_v26 = vsel %vm2079_vm11, %v2092_v27, 0.0 }
 0x8eb   : > { %2094 = vadd.xlane.f32.xlu1 %v2093_v26  ;;  %v2769_v26 = vld [vmem:[%s3003_s17 + $0x3] ss:$0 sm:$0xff] }
 0x95e   : > { %v2095_v2 = vpop.xlane.xlu1 %2094 }
 0x95f   : > { %v2096_v3 = vmul.f32 %v2095_v2, %v3236_v30 }
 0x961   : > { %v2097_v6 = vadd.f32 1e-05, %v2096_v3 }
 0x963   : > { %2788 = vrsqrt.f32 %v2097_v6  ;;  %vm2104_vm14 = vweird.f32 %v2097_v6 }
 0x969   : > { %v2789_v63 = vpop.eup %2788 }
 0x96a   : > { %v2099_v7 = vmul.f32 %v2789_v63, %v2097_v6  ;;  %vm2105_vm13 = vweird.f32 %v2789_v63 }
 0x96b   : > { %vm2106_vm15 = vmor %vm2104_vm14, %vm2105_vm13 }
 0x96c   : > { %v2100_v8 = vmul.f32 %v2789_v63, %v2099_v7 }
 0x96e   : > { %v2101_v9 = vmul.f32 0.5, %v2100_v8 }
 0x970   : > { %v2102_v10 = vsub.f32 1.5, %v2101_v9 }
 0x972   : > { %v2103_v11 = vmul.f32 %v2789_v63, %v2102_v10 }
 0x974   : > { %v2107_v13 = vsel %vm2106_vm15, %v2789_v63, %v2103_v11 }
 0x975   : > { %v2108_v15 = vmul.f32 %v2107_v13, %v2091_v24  ;;  %v2768_v24 = vld [vmem:[%s3003_s17 + $0x2] ss:$0 sm:$0xff] }
 0x977   : > { %v2110_v16 = vmul.f32 %v2764_v12, %v2108_v15 }
 0x979   : > { %v2112_v0 = vadd.f32 %v2765_v14, %v2110_v16 }
 0x97b   : > { %v2113_v17 = vpack.c.bf16 %v2112_v0, %v2112_v0 }
 0x97d   : > { %2590 = vmatmul.msk.bf16.vlgmr.msra.gmra.mxu3 %vm801_vm3, %v2113_v17 }
 0xa00   : > { %v2146_v31 = vpop.f32.mrf.mxu3 }
 0xa01   : > { %v2147_v32 = vadd.f32 %v2766_v25, %v2146_v31 }
 0xa03   : > { %v2151_v33 = vmul.f32 0.044715, %v2147_v32  ;;  %v2150_v38 = vmul.f32 0.5, %v2147_v32 }
 0xa05   : > { %v2152_v34 = vmul.f32 %v2151_v33, %v2147_v32 }
 0xa07   : > { %v2153_v35 = vmul.f32 %v2152_v34, %v2147_v32 }
 0xa08   : > { %v2148_v36 = vpop.f32.mrf.mxu3 }
 0xa09   : > { %v2154_v37 = vadd.f32 %v2153_v35, %v2147_v32 }
 0xa0b   : > { %v2155_v39 = vmul.f32 0.7978846, %v2154_v37 }
 0xa0d   : > { %2790 = vtanh.f32 %v2155_v39 }
 0xa13   : > { %v2791_v40 = vpop.eup %2790 }
 0xa14   : > { %v2157_v41 = vadd.f32 1.0, %v2791_v40 }
 0xa16   : > { %v2158_v42 = vmul.f32 %v2157_v41, %v2150_v38 }
 0xa18   : > { %v2159_v43 = vpack.c.bf16 %v2158_v42, %v2158_v42 }
 0xa1a   : > { %2236 = vmatmul.bf16.vlgmr.msrb.gmra.mxu0 %v2159_v43 }
 0xa97   : > { %v2237_v49 = vpop.f32.mrf.mxu0 }
 0xa98   : > { %v2238_v45 = vadd.f32 %v2767_v44, %v2237_v49 }
 0xa9a   : > { %v2241_v46 = vadd.f32 %v2238_v45, %v2112_v0 }
 0xa9c   : > { %v2244_v47 = vsel %vm2079_vm11, %v2241_v46, 0.0 }
 0xa9d   : > { %2245 = vadd.xlane.f32.xlu2 %v2244_v47 }
 0xa9f   : > { %v2239_v48 = vpop.f32.mrf.mxu0 }
 0xb10   : > { %v2246_v50 = vpop.xlane.xlu2 %2245 }
 0xb11   : > { %v2247_v51 = vmul.f32 %v2246_v50, %v3236_v30 }
 0xb13   : > { %v2248_v52 = vsub.f32 %v2241_v46, %v2247_v51 }
 0xb15   : > { %v2249_v53 = vmul.f32 %v2248_v52, %v2248_v52 }
 0xb17   : > { %v2250_v54 = vsel %vm2079_vm11, %v2249_v53, 0.0 }
 0xb18   : > { %2251 = vadd.xlane.f32.xlu0 %v2250_v54 }
 0xb8b   : > { %v2252_v55 = vpop.xlane.xlu0 %2251 }
 0xb8c   : > { %v2253_v56 = vmul.f32 %v2252_v55, %v3236_v30 }
 0xb8e   : > { %v2254_v57 = vadd.f32 1e-05, %v2253_v56 }
 0xb90   : > { %2792 = vrsqrt.f32 %v2254_v57  ;;  %vm2261_vm1 = vweird.f32 %v2254_v57 }
 0xb96   : > { %v2793_v58 = vpop.eup %2792 }
 0xb97   : > { %v2256_v59 = vmul.f32 %v2793_v58, %v2254_v57  ;;  %vm2262_vm0 = vweird.f32 %v2793_v58 }
 0xb98   : > { %vm2263_vm2 = vmor %vm2261_vm1, %vm2262_vm0 }
 0xb99   : > { %v2257_v60 = vmul.f32 %v2793_v58, %v2256_v59 }
 0xb9b   : > { %v2258_v28 = vmul.f32 0.5, %v2257_v60 }
 0xb9d   : > { %v2259_v61 = vsub.f32 1.5, %v2258_v28 }
 0xb9f   : > { %v2260_v20 = vmul.f32 %v2793_v58, %v2259_v61 }
 0xba1   : > { %v2264_v27 = vsel %vm2263_vm2, %v2793_v58, %v2260_v20 }
 0xba2   : > { %v2265_v62 = vmul.f32 %v2264_v27, %v2248_v52 }
 0xba4   : > { %v2267_v29 = vmul.f32 %v2768_v24, %v2265_v62  ;;  %2274 = sbr.rel (%p2623_p5) target bundleno = 3412 (0xd54), region = 100 }
 0xba6   : > { %v2269_v1 = vadd.f32 %v2769_v26, %v2267_v29 }
 0xba8   : > { %2270 = vst.msk [vmem:[#allocation2] sm:$0xf] %vm2079_vm11, %v2269_v1 }
 0xba9   : > { %v2276_v2 = vrot.slane %v2269_v1, 2  ;;  %v2280_v3 = vperm.slane %v2269_v1, 0  ;;  %vm2282_vm4 = vcmask 1041409   ;;  %vm2285_vm5 = vcmask 254976   ;;  %v2660_v22 = vld [vmem:[%s3318_s16 + $0x8] sm:$0xff]  ;;  %v2659_v23 = vld [vmem:[%s3318_s16] sm:$0xff] }
 0xbaa   : > { %v2850_v7 = vmov 269488144   ;;  %2385 = vmatpush.bf16.msra.mxu0 %v2660_v22  ;;  %v2794_v39 = vld [vmem:[%s3340_s18] ss:$0 sm:$0xff] }
 0xbab   : > { %v2281_v4 = vperm.slane %v2276_v2, 0  ;;  %v2292_v8 = vunpack.c.l.s4 %v2850_v7  ;;  %v2335_v43 = vrot.slane %v2794_v39, 1  ;;  %v2796_v57 = vld [vmem:[%s3342_s14] ss:$0 sm:$0xff] }
 0xbad   : > { %v2283_v6 = vsel %vm2282_vm4, %v2281_v4, %v2280_v3  ;;  %v2293_v9 = vunpack.c.0.s8 %v2292_v8 }
 0xbae   : > { %v2286_v63 = vsel %vm2285_vm5, %v2283_v6, 0.0  ;;  %2386 = vmatpush.bf16.msra.mxu0 %v2659_v23 }
 0xbaf   : > { %2287 = vadd.xlane.f32.xlu0 %v2286_v63 }
 0xc22   : > { %v2288_v10 = vpop.xlane.xlu0 %2287 }
 0xc23   : > { %v2289_v11 = vmul.f32 %v2288_v10, %v3236_v30 }
 0xc25   : > { %v2294_v12 = vperm.slane %v2289_v11, %v2293_v9 }
 0xc27   : > { %v2295_v13 = vrot.slane %v2294_v12, 1  ;;  %v2298_v14 = vsub.f32 %v2269_v1, %v2294_v12 }
 0xc29   : > { %v2299_v15 = vsub.f32 %v2276_v2, %v2295_v13  ;;  %v2300_v16 = vmul.f32 %v2298_v14, %v2298_v14 }
 0xc2b   : > { %v2301_v0 = vmul.f32 %v2299_v15, %v2299_v15  ;;  %v2304_v17 = vperm.slane %v2300_v16, 0 }
 0xc2d   : > { %v2305_v18 = vperm.slane %v2301_v0, 0 }
 0xc2f   : > { %v2306_v19 = vsel %vm2282_vm4, %v2305_v18, %v2304_v17 }
 0xc30   : > { %v2308_v21 = vsel %vm2285_vm5, %v2306_v19, 0.0 }
 0xc31   : > { %2309 = vadd.xlane.f32.xlu0 %v2308_v21 }
 0xca4   : > { %v2310_v5 = vpop.xlane.xlu0 %2309 }
 0xca5   : > { %v2311_v25 = vmul.f32 %v2310_v5, %v3236_v30  ;;  %v2795_v30 = vld [vmem:[%s3341_s1] ss:$0 sm:$0xff] }
 0xca6   : > { %v2342_v45 = vrot.slane %v2795_v30, 1 }
 0xca7   : > { %v2312_v31 = vadd.f32 1e-05, %v2311_v25 }
 0xca9   : > { %2797 = vrsqrt.f32 %v2312_v31  ;;  %vm2319_vm7 = vweird.f32 %v2312_v31 }
 0xcaf   : > { %v2798_v32 = vpop.eup %2797 }
 0xcb0   : > { %v2314_v33 = vmul.f32 %v2798_v32, %v2312_v31  ;;  %vm2320_vm6 = vweird.f32 %v2798_v32 }
 0xcb1   : > { %vm2321_vm8 = vmor %vm2319_vm7, %vm2320_vm6 }
 0xcb2   : > { %v2315_v34 = vmul.f32 %v2798_v32, %v2314_v33 }
 0xcb4   : > { %v2316_v35 = vmul.f32 0.5, %v2315_v34 }
 0xcb6   : > { %v2317_v36 = vsub.f32 1.5, %v2316_v35 }
 0xcb8   : > { %v2318_v37 = vmul.f32 %v2798_v32, %v2317_v36 }
 0xcba   : > { %v2322_v40 = vsel %vm2321_vm8, %v2798_v32, %v2318_v37 }
 0xcbb   : > { %v2327_v38 = vperm.slane %v2322_v40, %v2293_v9 }
 0xcbd   : > { %v2328_v41 = vrot.slane %v2327_v38, 1  ;;  %v2331_v42 = vmul.f32 %v2327_v38, %v2298_v14 }
 0xcbf   : > { %v2332_v44 = vmul.f32 %v2328_v41, %v2299_v15  ;;  %v2338_v49 = vmul.f32 %v2794_v39, %v2331_v42 }
 0xcc1   : > { %v2339_v46 = vmul.f32 %v2335_v43, %v2332_v44  ;;  %v2345_v47 = vadd.f32 %v2795_v30, %v2338_v49 }
 0xcc3   : > { %v2346_v48 = vadd.f32 %v2342_v45, %v2339_v46  ;;  %v2347_v50 = vpack.c.bf16 %v2345_v47, %v2345_v47 }
 0xcc5   : > { %v2348_v51 = vpack.c.bf16 %v2346_v48, %v2346_v48  ;;  %v2359_v53 = vunpack.c.l.b16 %v2347_v50 }
 0xcc7   : > { %v2360_v52 = vunpack.c.l.b16 %v2348_v51 }
 0xcc9   : > { %v2361_v54 = vrot.slane %v2360_v52, 7 }
 0xccb   : > { %v2362_v55 = vsel %vm2282_vm4, %v2361_v54, %v2359_v53 }
 0xccc   : > { %v2363_v56 = vpack.c.b16 %v2362_v55, %v2362_v55 }
 0xcce   : > { %2632 = vmatmul.msk.bf16.vlgmr.msra.gmra.mxu0 %vm801_vm3, %v2363_v56 }
 0xd4b   : > { %v2388_v58 = vpop.f32.mrf.mxu0 }
 0xd4c   : > { %v2389_v59 = vadd.f32 %v2796_v57, %v2388_v58 }
 0xd4e   : > { %2392 = vst [vmem:[#allocation3] sm:$0x3] %v2389_v59 }
 0xd53   : > { %v2390_v60 = vpop.f32.mrf.mxu0 }
 0xd54 PF: > { %p2665_p6 = scmp.eq.s32.totalorder %s2953_s28, 1  ;;  %s2851_s27 = smov [#allocation3]  }
 0xd55   : > { %s2399_s21 = sshll.u32 %s2851_s27, 4  ;;  %s3343_s2 = sld [smem:[#allocation15_spill]]  ;;  %s2400_s21 = int_to_ptr.vmem [resolvable:$true] %s2399_s21 }
 0xd5b   : > { %s2401_s22 = sshll.u32 %s3343_s2, 4  ;;  %s2402_s22 = int_to_ptr.hbm [resolvable:$true] %s2401_s22 }
 0xd5c   : > { %2662 = dma.vmem_to_hbm [thread:$0]  (%p2665_p6), %s2400_s21, 32, %s2402_s22, [#allocation4]  }
 0xd5d   : > { %2832 = dma.done.wait (%p2665_p6), [#allocation4], 32  }
 0xd5e   : > { %2834 = vsyncadd (%p2665_p6), [#allocation4], 4294967264 }
 0xd5f PF: > { %s3344_s29 = sld [smem:[#allocation6_spill]] }
 0xd65   : > { %s29_s27 = sadd.s32 1, %s3344_s29  }
 0xd66   : > { %p26_p7 = scmp.ge.s32.totalorder %s29_s27, 4  }
 0xd68   :  { %28 = sbr.rel (!%p26_p7) target bundleno = 11 (0xb), region = 152 }
 0xd6d   :  { %2415 = vsyncpa [#allocation4], 1 }
 0xd6e   :  { %2417 = vsyncpa [#allocation4 + $0x1], 1 }

</bundles_post_ra>
